<compile_context>
chip_gen: v6e
topology: v6e:2x2x1
jax: 0.10.0
libtpu: 0.0.40
codegen_flags: <defaults>
</compile_context>

<pallas_src>
import functools

import jax
import jax.numpy as jnp
import numpy as np
from jax.experimental import pallas as pl
from jax.experimental.pallas import tpu as pltpu


# ----------------------------- in-kernel helpers -----------------------------
def _erf(x):
    # Abramowitz & Stegun 7.1.26 rational approximation (|err| < 1.5e-7) so the
    # exact (erf-based) GELU semantics of PyTorch activation='gelu' are preserved.
    # TODO(synk): switch to jax.lax.erf / tanh-GELU once Mosaic erf lowering is confirmed.
    a1, a2, a3, a4, a5 = 0.254829592, -0.284496736, 1.421413741, -1.453152027, 1.061405429
    p = 0.3275911
    sgn = jnp.where(x >= 0.0, 1.0, -1.0)
    ax = jnp.abs(x)
    t = 1.0 / (1.0 + p * ax)
    poly = ((((a5 * t + a4) * t + a3) * t + a2) * t + a1) * t
    return sgn * (1.0 - poly * jnp.exp(-ax * ax))


def _gelu_exact(x):
    return 0.5 * x * (1.0 + _erf(x * (1.0 / np.sqrt(2.0))))


def _layernorm(x, g, b, eps=1e-5):
    mu = jnp.mean(x, axis=-1, keepdims=True)
    xc = x - mu
    var = jnp.mean(xc * xc, axis=-1, keepdims=True)
    return xc * jax.lax.rsqrt(var + eps) * g + b


# packed per-layer vector rows (axis 0 of the (9, H) vec block)
_BQ, _BK, _BV, _BO, _LN1G, _LN1B, _B2, _LN2G, _LN2B = range(9)


# --------------------------------- fused kernel --------------------------------
def fused_transformer_kernel(
        x_ref, pe_ref, embw_ref, embb_ref,
        wqkv_ref, wo_ref, w1_ref, w2_ref, vec_ref, b1_ref,
        outw_ref, outb_ref,
        o_ref,
        h_ref,
        *, num_heads, seq):
    l = pl.program_id(1)
    n_layers = pl.num_programs(1)
    Nt, H = h_ref.shape                      # tokens in this batch tile, hidden
    S = seq
    tb = Nt // S                             # batch elements in this tile
    hd = H // num_heads
    scale = 1.0 / np.sqrt(hd)
    Din = x_ref.shape[-1]

    # ---- grid step l==0: embedding (VPU FMAs, Din tiny) + positional encoding ----
    @pl.when(l == 0)
    def _():
        xv = x_ref[...]                                    # (Nt, Din)
        emb = embb_ref[...]                                # (1, H) -> broadcasts
        for d in range(Din):                               # static unroll (Din == 2)
            emb = emb + xv[:, d:d + 1] * embw_ref[d:d + 1, :]
        h_ref[...] = (emb.reshape(tb, S, H) + pe_ref[...][None, :, :]).reshape(Nt, H)

    # ---- one post-norm encoder layer; layer-l weights streamed by BlockSpec ----
    x2 = h_ref[...]                                        # (Nt, H) f32 resident
    xb = x2.astype(jnp.bfloat16)
    vecv = vec_ref[...]                                    # (9, H) packed vectors

    def vrow(i):
        return vecv[i:i + 1, :]                            # (1, H) f32

    # three (H,H) matmuls (H < 128 -> keep projections lane-aligned, no 3H slicing)
    q = jnp.dot(xb, wqkv_ref[0], preferred_element_type=jnp.float32) + vrow(_BQ)
    k = jnp.dot(xb, wqkv_ref[1], preferred_element_type=jnp.float32) + vrow(_BK)
    v = jnp.dot(xb, wqkv_ref[2], preferred_element_type=jnp.float32) + vrow(_BV)
    qh = q.reshape(tb, S, H).astype(jnp.bfloat16)
    kh = k.reshape(tb, S, H).astype(jnp.bfloat16)
    vh = v.reshape(tb, S, H).astype(jnp.bfloat16)

    # per-head attention; contexts concatenated in registers (no VMEM ctx scratch,
    # no masked partial stores) then fed to ONE wide Wo matmul.
    heads = []
    for h in range(num_heads):                             # static unroll
        sl = slice(h * hd, (h + 1) * hd)
        s = jnp.einsum('bqd,bkd->bqk', qh[:, :, sl], kh[:, :, sl],
                       preferred_element_type=jnp.float32) * scale
        s = s - jnp.max(s, axis=-1, keepdims=True)
        p = jnp.exp(s)
        p = p * pl.reciprocal(jnp.sum(p, axis=-1, keepdims=True), approx=True)
        heads.append(jnp.einsum('bqk,bkd->bqd', p.astype(jnp.bfloat16), vh[:, :, sl],
                                preferred_element_type=jnp.float32))
    ctx = jnp.concatenate(heads, axis=-1).reshape(Nt, H)

    attn = jnp.dot(ctx.astype(jnp.bfloat16), wo_ref[...],
                   preferred_element_type=jnp.float32) + vrow(_BO)
    h1 = _layernorm(x2 + attn, vrow(_LN1G), vrow(_LN1B))

    ff = jnp.dot(h1.astype(jnp.bfloat16), w1_ref[...],
                 preferred_element_type=jnp.float32) + b1_ref[...]
    ff = _gelu_exact(ff)
    ff = jnp.dot(ff.astype(jnp.bfloat16), w2_ref[...],
                 preferred_element_type=jnp.float32) + vrow(_B2)

    h2 = _layernorm(h1 + ff, vrow(_LN2G), vrow(_LN2B))
    h_ref[...] = h2                                        # activation stays in VMEM

    # ---- last grid step: fc_out(H->1) + sigmoid, emitted as a (1, Nt) lane slab ----
    @pl.when(l == n_layers - 1)
    def _():
        logits = jnp.einsum('oh,nh->on', outw_ref[...], h2,
                            preferred_element_type=jnp.float32) + outb_ref[...]
        o_ref[...] = 1.0 / (1.0 + jnp.exp(-logits))        # exact sigmoid, f32


# ------------------------------- glue / wrapper -------------------------------
def positional_encoding(seq_len, d_model):
    pos = jnp.arange(seq_len, dtype=jnp.float32)[:, None]
    div = jnp.exp(jnp.arange(0, d_model, 2, dtype=jnp.float32) * (-np.log(10000.0) / d_model))
    ang = pos * div                                        # (S, d_model//2)
    pe = jnp.stack([jnp.sin(ang), jnp.cos(ang)], axis=-1).reshape(seq_len, d_model)
    return pe                                              # pe[:, 0::2]=sin, pe[:, 1::2]=cos


def init_params(key, input_dim, hidden, num_layers):
    ff = hidden * 4
    keys = iter(jax.random.split(key, 8 + 16 * num_layers))

    def w(k, fi, fo):
        return (jax.random.normal(k, (fi, fo), jnp.float32) / np.sqrt(fi)).astype(jnp.float32)

    def b(k, fo):
        return (0.01 * jax.random.normal(k, (1, fo), jnp.float32)).astype(jnp.float32)

    params = {
        'emb_w': w(next(keys), input_dim, hidden),
        'emb_b': b(next(keys), hidden),
        'out_w': w(next(keys), 1, hidden),                 # PyTorch fc_out.weight shape (1, H)
        'out_b': 0.01 * jax.random.normal(next(keys), (1, 1), jnp.float32),
        'layers': [],
    }
    for _ in range(num_layers):
        lp = {
            'wq': w(next(keys), hidden, hidden), 'bq': b(next(keys), hidden),
            'wk': w(next(keys), hidden, hidden), 'bk': b(next(keys), hidden),
            'wv': w(next(keys), hidden, hidden), 'bv': b(next(keys), hidden),
            'wo': w(next(keys), hidden, hidden), 'bo': b(next(keys), hidden),
            'ln1_g': jnp.ones((1, hidden), jnp.float32), 'ln1_b': jnp.zeros((1, hidden), jnp.float32),
            'w1': w(next(keys), hidden, ff), 'b1': b(next(keys), ff),
            'w2': w(next(keys), ff, hidden), 'b2': b(next(keys), hidden),
            'ln2_g': jnp.ones((1, hidden), jnp.float32), 'ln2_b': jnp.zeros((1, hidden), jnp.float32),
        }
        params['layers'].append(lp)
    return params


def transformer_penet_forward(x, params, num_heads, batch_tiles=1):
    B, S, Din = x.shape
    H = params['emb_w'].shape[1]
    F = params['layers'][0]['w1'].shape[1]
    L = len(params['layers'])
    N = B * S
    assert B % batch_tiles == 0
    tb = B // batch_tiles
    Nt = tb * S
    # with >1 batch tiles the (1, Nt) output block must stay lane-aligned
    assert batch_tiles == 1 or Nt % 128 == 0

    pe = positional_encoding(S, H)                         # (S, H) — NOT pre-broadcast
    x2 = x.reshape(N, Din)

    # stacked per-layer weights (bf16: halves streamed HBM bytes, f32 accum in-kernel)
    wqkv = jnp.stack([jnp.stack([lp['wq'], lp['wk'], lp['wv']], axis=0)
                      for lp in params['layers']], axis=0).astype(jnp.bfloat16)   # (L,3,H,H)
    wo = jnp.stack([lp['wo'] for lp in params['layers']], 0).astype(jnp.bfloat16)  # (L,H,H)
    w1 = jnp.stack([lp['w1'] for lp in params['layers']], 0).astype(jnp.bfloat16)  # (L,H,F)
    w2 = jnp.stack([lp['w2'] for lp in params['layers']], 0).astype(jnp.bfloat16)  # (L,F,H)
    # 9 H-wide per-layer vectors packed -> a single small DMA per layer step
    vecs = jnp.stack([jnp.concatenate(
        [lp['bq'], lp['bk'], lp['bv'], lp['bo'],
         lp['ln1_g'], lp['ln1_b'], lp['b2'], lp['ln2_g'], lp['ln2_b']], axis=0)
        for lp in params['layers']], axis=0)                                        # (L,9,H) f32
    b1 = jnp.stack([lp['b1'] for lp in params['layers']], 0)                        # (L,1,F) f32

    def const(*shape):        # whole array, fetched once (block index never changes)
        return pl.BlockSpec(shape, lambda bt, l, _n=len(shape): (0,) * _n)

    def perlayer(*shape):     # leading layer axis squeezed; prefetched layer-by-layer
        return pl.BlockSpec((None,) + shape, lambda bt, l, _n=len(shape): (l,) + (0,) * _n)

    # VMEM budget: double-buffered per-layer weight set + consts + resident activation
    layer_bytes = 2 * (3 * H * H + H * H + H * F + F * H) + 4 * (9 * H + F)
    const_bytes = 4 * (N * Din + S * H + Din * H + 2 * H + 1 + N)
    scratch_bytes = 4 * Nt * H
    vmem_limit = int(min(64 * 2 ** 20,
                         max(32 * 2 ** 20,
                             4 * (2 * layer_bytes + const_bytes + scratch_bytes))))

    grid_spec = pltpu.PrefetchScalarGridSpec(
        num_scalar_prefetch=0,
        grid=(batch_tiles, L),
        in_specs=[
            pl.BlockSpec((Nt, Din), lambda bt, l: (bt, 0)),        # x (per batch tile)
            const(S, H), const(Din, H), const(1, H),               # pe, emb_w, emb_b
            perlayer(3, H, H),                                     # wq / wk / wv
            perlayer(H, H),                                        # wo
            perlayer(H, F), perlayer(F, H),                        # w1, w2
            perlayer(9, H), perlayer(1, F),                        # packed vectors, b1
            const(1, H), const(1, 1),                              # out_w, out_b
        ],
        out_specs=pl.BlockSpec((1, Nt), lambda bt, l: (0, bt)),    # lane-flattened output
        scratch_shapes=[pltpu.VMEM((Nt, H), jnp.float32)],         # resident activation
    )

    fused = pl.pallas_call(
        functools.partial(fused_transformer_kernel, num_heads=num_heads, seq=S),
        out_shape=jax.ShapeDtypeStruct((1, N), jnp.float32),
        grid_spec=grid_spec,
        compiler_params=pltpu.CompilerParams(
            dimension_semantics=("parallel", "arbitrary"),         # batch tiles ∥, layers seq
            vmem_limit_bytes=vmem_limit),
    )
    out = fused(x2, pe, params['emb_w'], params['emb_b'],
                wqkv, wo, w1, w2, vecs, b1,
                params['out_w'], params['out_b'])
    return out.reshape(B, S)


# ------------------------------ pure-JAX reference ----------------------------
def reference_forward(x, params, num_heads):
    B, S, _ = x.shape
    H = params['emb_w'].shape[1]
    hd = H // num_heads
    pe = positional_encoding(S, H)

    def ln(z, g, b, eps=1e-5):
        mu = jnp.mean(z, -1, keepdims=True)
        var = jnp.mean((z - mu) ** 2, -1, keepdims=True)
        return (z - mu) / jnp.sqrt(var + eps) * g + b

    with jax.default_matmul_precision('highest'):
        h = x @ params['emb_w'] + params['emb_b'] + pe[None]
        for lp in params['layers']:
            q = (h @ lp['wq'] + lp['bq']).reshape(B, S, num_heads, hd)
            k = (h @ lp['wk'] + lp['bk']).reshape(B, S, num_heads, hd)
            v = (h @ lp['wv'] + lp['bv']).reshape(B, S, num_heads, hd)
            s = jnp.einsum('bqnd,bknd->bnqk', q, k) / np.sqrt(hd)
            p = jax.nn.softmax(s, axis=-1)
            ctx = jnp.einsum('bnqk,bknd->bqnd', p, v).reshape(B, S, H)
            attn = ctx @ lp['wo'] + lp['bo']
            h = ln(h + attn, lp['ln1_g'], lp['ln1_b'])
            ffv = jax.nn.gelu(h @ lp['w1'] + lp['b1'], approximate=False)
            ffv = ffv @ lp['w2'] + lp['b2']
            h = ln(h + ffv, lp['ln2_g'], lp['ln2_b'])
        logits = jnp.einsum('bsh,oh->bs', h, params['out_w']) + params['out_b'][0, 0]
        return jax.nn.sigmoid(logits)


# ------------------------------------ main ------------------------------------
if __name__ == "__main__":
    # small shapes consistent with the module: (batch, seq, input_dim=2)
    B, S = 2, 8
    INPUT_DIM, HIDDEN, NUM_LAYERS, NUM_HEADS = 2, 32, 2, 4

    key = jax.random.PRNGKey(0)
    kx, kp = jax.random.split(key)
    x = jax.random.normal(kx, (B, S, INPUT_DIM), jnp.float32)
    params = init_params(kp, INPUT_DIM, HIDDEN, NUM_LAYERS)

    out = transformer_penet_forward(x, params, NUM_HEADS)
    out = jax.block_until_ready(out)

    ref = jax.block_until_ready(reference_forward(x, params, NUM_HEADS))
    # tolerance widened vs the f32 reference: matmul operands are bf16 (f32 accum),
    # and the softmax denominator uses the approx EUP reciprocal.
    np.testing.assert_allclose(np.asarray(out), np.asarray(ref), atol=2e-2, rtol=2e-2)
    assert out.shape == (B, S)

    print("KERNEL_OK")
</pallas_src>

<mosaic_0001>
module attributes {stable_mosaic.version = 11 : i64} {
  func.func @fused_transformer_kernel(%arg0: i32, %arg1: i32, %arg2: memref<16x2xf32, #tpu.memory_space<vmem>>, %arg3: memref<8x32xf32, #tpu.memory_space<vmem>>, %arg4: memref<2x32xf32, #tpu.memory_space<vmem>>, %arg5: memref<1x32xf32, #tpu.memory_space<vmem>>, %arg6: memref<1x3x32x32xbf16, #tpu.memory_space<vmem>>, %arg7: memref<1x32x32xbf16, #tpu.memory_space<vmem>>, %arg8: memref<1x32x128xbf16, #tpu.memory_space<vmem>>, %arg9: memref<1x128x32xbf16, #tpu.memory_space<vmem>>, %arg10: memref<1x9x32xf32, #tpu.memory_space<vmem>>, %arg11: memref<1x1x128xf32, #tpu.memory_space<vmem>>, %arg12: memref<1x32xf32, #tpu.memory_space<vmem>>, %arg13: memref<1x1xf32, #tpu.memory_space<vmem>>, %arg14: memref<1x16xf32, #tpu.memory_space<vmem>>, %arg15: memref<16x32xf32, #tpu.memory_space<vmem>>) attributes {dimension_semantics = [#tpu.dimension_semantics<parallel>, #tpu.dimension_semantics<arbitrary>], iteration_bounds = array<i64: 1, 2>, scalar_prefetch = 0 : i64, scratch_operands = 1 : i64, tpu.core_type = #tpu.core_type<tc>, window_params = [{transform_indices = @transform_0, window_bounds = array<i64: 16, 2>}, {pipeline_mode = #tpu.pipeline_mode<synchronous>, transform_indices = @transform_1, window_bounds = array<i64: 8, 32>}, {pipeline_mode = #tpu.pipeline_mode<synchronous>, transform_indices = @transform_2, window_bounds = array<i64: 2, 32>}, {pipeline_mode = #tpu.pipeline_mode<synchronous>, transform_indices = @transform_3, window_bounds = array<i64: 1, 32>}, {transform_indices = @transform_4, window_bounds = array<i64: 1, 3, 32, 32>}, {transform_indices = @transform_5, window_bounds = array<i64: 1, 32, 32>}, {transform_indices = @transform_6, window_bounds = array<i64: 1, 32, 128>}, {transform_indices = @transform_7, window_bounds = array<i64: 1, 128, 32>}, {transform_indices = @transform_8, window_bounds = array<i64: 1, 9, 32>}, {transform_indices = @transform_9, window_bounds = array<i64: 1, 1, 128>}, {pipeline_mode = #tpu.pipeline_mode<synchronous>, transform_indices = @transform_10, window_bounds = array<i64: 1, 32>}, {pipeline_mode = #tpu.pipeline_mode<synchronous>, transform_indices = @transform_11, window_bounds = array<i64: 1, 1>}, {transform_indices = @transform_12, window_bounds = array<i64: 1, 16>}]} {
    %c0_i32 = arith.constant 0 : i32
    %0 = arith.cmpi eq, %arg1, %c0_i32 : i32
    %1 = arith.extui %0 : i1 to i32
    %c0_i32_0 = arith.constant 0 : i32
    %2 = arith.cmpi ne, %1, %c0_i32_0 : i32
    scf.if %2 {
      %c0_81 = arith.constant 0 : index
      %c0_82 = arith.constant 0 : index
      %218 = vector.load %arg2[%c0_81, %c0_82] : memref<16x2xf32, #tpu.memory_space<vmem>>, vector<16x2xf32>
      %c0_83 = arith.constant 0 : index
      %c0_84 = arith.constant 0 : index
      %219 = vector.load %arg5[%c0_83, %c0_84] : memref<1x32xf32, #tpu.memory_space<vmem>>, vector<1x32xf32>
      %220 = vector.extract_strided_slice %218 {offsets = [0, 0], sizes = [16, 1], strides = [1, 1]} : vector<16x2xf32> to vector<16x1xf32>
      %c0_85 = arith.constant 0 : index
      %c0_86 = arith.constant 0 : index
      %221 = vector.load %arg4[%c0_85, %c0_86] : memref<2x32xf32, #tpu.memory_space<vmem>>, vector<1x32xf32>
      %222 = vector.broadcast %220 : vector<16x1xf32> to vector<16x32xf32>
      %223 = vector.broadcast %221 : vector<1x32xf32> to vector<16x32xf32>
      %224 = arith.mulf %222, %223 : vector<16x32xf32>
      %225 = vector.broadcast %219 : vector<1x32xf32> to vector<16x32xf32>
      %226 = arith.addf %225, %224 : vector<16x32xf32>
      %227 = vector.extract_strided_slice %218 {offsets = [0, 1], sizes = [16, 1], strides = [1, 1]} : vector<16x2xf32> to vector<16x1xf32>
      %c1_87 = arith.constant 1 : index
      %c0_88 = arith.constant 0 : index
      %228 = vector.load %arg4[%c1_87, %c0_88] : memref<2x32xf32, #tpu.memory_space<vmem>>, vector<1x32xf32>
      %229 = vector.broadcast %227 : vector<16x1xf32> to vector<16x32xf32>
      %230 = vector.broadcast %228 : vector<1x32xf32> to vector<16x32xf32>
      %231 = arith.mulf %229, %230 : vector<16x32xf32>
      %232 = arith.addf %226, %231 : vector<16x32xf32>
      %233 = vector.shape_cast %232 : vector<16x32xf32> to vector<2x8x32xf32>
      %c0_89 = arith.constant 0 : index
      %c0_90 = arith.constant 0 : index
      %234 = vector.load %arg3[%c0_89, %c0_90] : memref<8x32xf32, #tpu.memory_space<vmem>>, vector<8x32xf32>
      %235 = vector.shape_cast %234 : vector<8x32xf32> to vector<1x8x32xf32>
      %236 = vector.broadcast %235 : vector<1x8x32xf32> to vector<2x8x32xf32>
      %237 = arith.addf %233, %236 : vector<2x8x32xf32>
      %238 = vector.shape_cast %237 : vector<2x8x32xf32> to vector<16x32xf32>
      %c0_91 = arith.constant 0 : index
      %c0_92 = arith.constant 0 : index
      %239 = vector.load %arg15[%c0_91, %c0_92] : memref<16x32xf32, #tpu.memory_space<vmem>>, vector<16x32xf32>
      tpu.vector_store %arg15[%c0_91, %c0_92], %238 {strides = array<i32>} : memref<16x32xf32, #tpu.memory_space<vmem>>, vector<16x32xf32>,
    } else {
    }
    %c0 = arith.constant 0 : index
    %c0_1 = arith.constant 0 : index
    %3 = vector.load %arg15[%c0, %c0_1] : memref<16x32xf32, #tpu.memory_space<vmem>>, vector<16x32xf32>
    %4 = arith.truncf %3 : vector<16x32xf32> to vector<16x32xbf16>
    %c0_2 = arith.constant 0 : index
    %c0_3 = arith.constant 0 : index
    %c0_4 = arith.constant 0 : index
    %5 = vector.load %arg10[%c0_2, %c0_3, %c0_4] : memref<1x9x32xf32, #tpu.memory_space<vmem>>, vector<1x9x32xf32>
    %6 = vector.shape_cast %5 : vector<1x9x32xf32> to vector<9x32xf32>
    %c0_5 = arith.constant 0 : index
    %c0_6 = arith.constant 0 : index
    %c0_7 = arith.constant 0 : index
    %c0_8 = arith.constant 0 : index
    %7 = vector.load %arg6[%c0_5, %c0_6, %c0_7, %c0_8] : memref<1x3x32x32xbf16, #tpu.memory_space<vmem>>, vector<1x1x32x32xbf16>
    %8 = vector.shape_cast %7 : vector<1x1x32x32xbf16> to vector<32x32xbf16>
    %cst = arith.constant dense<0.000000e+00> : vector<16x32xf32>
    %9 = tpu.matmul %4, %8, %cst {dimension_numbers = #tpu.dot_dimension_numbers<[1], [0], [0], [1], [0, 0, 1, 1], [], []>} : vector<16x32xbf16>, vector<32x32xbf16>, vector<16x32xf32> -> vector<16x32xf32>
    %10 = vector.extract_strided_slice %6 {offsets = [0, 0], sizes = [1, 32], strides = [1, 1]} : vector<9x32xf32> to vector<1x32xf32>
    %11 = vector.broadcast %10 : vector<1x32xf32> to vector<16x32xf32>
    %12 = arith.addf %9, %11 : vector<16x32xf32>
    %c0_9 = arith.constant 0 : index
    %c1 = arith.constant 1 : index
    %c0_10 = arith.constant 0 : index
    %c0_11 = arith.constant 0 : index
    %13 = vector.load %arg6[%c0_9, %c1, %c0_10, %c0_11] : memref<1x3x32x32xbf16, #tpu.memory_space<vmem>>, vector<1x1x32x32xbf16>
    %14 = vector.shape_cast %13 : vector<1x1x32x32xbf16> to vector<32x32xbf16>
    %cst_12 = arith.constant dense<0.000000e+00> : vector<16x32xf32>
    %15 = tpu.matmul %4, %14, %cst_12 {dimension_numbers = #tpu.dot_dimension_numbers<[1], [0], [0], [1], [0, 0, 1, 1], [], []>} : vector<16x32xbf16>, vector<32x32xbf16>, vector<16x32xf32> -> vector<16x32xf32>
    %16 = vector.extract_strided_slice %6 {offsets = [1, 0], sizes = [1, 32], strides = [1, 1]} : vector<9x32xf32> to vector<1x32xf32>
    %17 = vector.broadcast %16 : vector<1x32xf32> to vector<16x32xf32>
    %18 = arith.addf %15, %17 : vector<16x32xf32>
    %c0_13 = arith.constant 0 : index
    %c2 = arith.constant 2 : index
    %c0_14 = arith.constant 0 : index
    %c0_15 = arith.constant 0 : index
    %19 = vector.load %arg6[%c0_13, %c2, %c0_14, %c0_15] : memref<1x3x32x32xbf16, #tpu.memory_space<vmem>>, vector<1x1x32x32xbf16>
    %20 = vector.shape_cast %19 : vector<1x1x32x32xbf16> to vector<32x32xbf16>
    %cst_16 = arith.constant dense<0.000000e+00> : vector<16x32xf32>
    %21 = tpu.matmul %4, %20, %cst_16 {dimension_numbers = #tpu.dot_dimension_numbers<[1], [0], [0], [1], [0, 0, 1, 1], [], []>} : vector<16x32xbf16>, vector<32x32xbf16>, vector<16x32xf32> -> vector<16x32xf32>
    %22 = vector.extract_strided_slice %6 {offsets = [2, 0], sizes = [1, 32], strides = [1, 1]} : vector<9x32xf32> to vector<1x32xf32>
    %23 = vector.broadcast %22 : vector<1x32xf32> to vector<16x32xf32>
    %24 = arith.addf %21, %23 : vector<16x32xf32>
    %25 = vector.shape_cast %12 : vector<16x32xf32> to vector<2x8x32xf32>
    %26 = arith.truncf %25 : vector<2x8x32xf32> to vector<2x8x32xbf16>
    %27 = vector.shape_cast %18 : vector<16x32xf32> to vector<2x8x32xf32>
    %28 = arith.truncf %27 : vector<2x8x32xf32> to vector<2x8x32xbf16>
    %29 = vector.shape_cast %24 : vector<16x32xf32> to vector<2x8x32xf32>
    %30 = arith.truncf %29 : vector<2x8x32xf32> to vector<2x8x32xbf16>
    %31 = vector.extract_strided_slice %26 {offsets = [0, 0, 0], sizes = [2, 8, 8], strides = [1, 1, 1]} : vector<2x8x32xbf16> to vector<2x8x8xbf16>
    %32 = vector.extract_strided_slice %28 {offsets = [0, 0, 0], sizes = [2, 8, 8], strides = [1, 1, 1]} : vector<2x8x32xbf16> to vector<2x8x8xbf16>
    "tpu.trace_start"() <{level = 10 : i32, message = "bqd,bkd->bqk"}> : () -> ()
    %cst_17 = arith.constant dense<0.000000e+00> : vector<2x8x8xf32>
    %33 = tpu.matmul %31, %32, %cst_17 {dimension_numbers = #tpu.dot_dimension_numbers<[2], [2], [1], [1], [0, 0, 0, 1, 1, 1], [0], [0]>} : vector<2x8x8xbf16>, vector<2x8x8xbf16>, vector<2x8x8xf32> -> vector<2x8x8xf32>
    "tpu.trace_stop"() : () -> ()
    %cst_18 = arith.constant 0.353553385 : f32
    %34 = vector.broadcast %cst_18 : f32 to vector<2x8x8xf32>
    %35 = arith.mulf %33, %34 : vector<2x8x8xf32>
    %cst_19 = arith.constant dense<0xFF800000> : vector<2x8xf32>
    %36 = vector.multi_reduction <maximumf>, %35, %cst_19 [2] : vector<2x8x8xf32> to vector<2x8xf32>
    %37 = vector.shape_cast %36 : vector<2x8xf32> to vector<2x8x1xf32>
    %38 = vector.broadcast %37 : vector<2x8x1xf32> to vector<2x8x8xf32>
    %39 = arith.subf %35, %38 : vector<2x8x8xf32>
    %40 = math.exp %39 : vector<2x8x8xf32>
    %cst_20 = arith.constant dense<0.000000e+00> : vector<2x8xf32>
    %41 = vector.multi_reduction <add>, %40, %cst_20 [2] : vector<2x8x8xf32> to vector<2x8xf32>
    %42 = vector.shape_cast %41 : vector<2x8xf32> to vector<2x8x1xf32>
    %43 = tpu.reciprocal %42 {approx = true} : vector<2x8x1xf32> -> vector<2x8x1xf32>
    %44 = vector.broadcast %43 : vector<2x8x1xf32> to vector<2x8x8xf32>
    %45 = arith.mulf %40, %44 : vector<2x8x8xf32>
    %46 = arith.truncf %45 : vector<2x8x8xf32> to vector<2x8x8xbf16>
    %47 = vector.extract_strided_slice %30 {offsets = [0, 0, 0], sizes = [2, 8, 8], strides = [1, 1, 1]} : vector<2x8x32xbf16> to vector<2x8x8xbf16>
    "tpu.trace_start"() <{level = 10 : i32, message = "bqk,bkd->bqd"}> : () -> ()
    %cst_21 = arith.constant dense<0.000000e+00> : vector<2x8x8xf32>
    %48 = tpu.matmul %46, %47, %cst_21 {dimension_numbers = #tpu.dot_dimension_numbers<[2], [1], [1], [2], [0, 0, 0, 1, 1, 2], [0], [0]>} : vector<2x8x8xbf16>, vector<2x8x8xbf16>, vector<2x8x8xf32> -> vector<2x8x8xf32>
    "tpu.trace_stop"() : () -> ()
    %49 = vector.extract_strided_slice %26 {offsets = [0, 0, 8], sizes = [2, 8, 8], strides = [1, 1, 1]} : vector<2x8x32xbf16> to vector<2x8x8xbf16>
    %50 = vector.extract_strided_slice %28 {offsets = [0, 0, 8], sizes = [2, 8, 8], strides = [1, 1, 1]} : vector<2x8x32xbf16> to vector<2x8x8xbf16>
    "tpu.trace_start"() <{level = 10 : i32, message = "bqd,bkd->bqk"}> : () -> ()
    %cst_22 = arith.constant dense<0.000000e+00> : vector<2x8x8xf32>
    %51 = tpu.matmul %49, %50, %cst_22 {dimension_numbers = #tpu.dot_dimension_numbers<[2], [2], [1], [1], [0, 0, 0, 1, 1, 1], [0], [0]>} : vector<2x8x8xbf16>, vector<2x8x8xbf16>, vector<2x8x8xf32> -> vector<2x8x8xf32>
    "tpu.trace_stop"() : () -> ()
    %cst_23 = arith.constant 0.353553385 : f32
    %52 = vector.broadcast %cst_23 : f32 to vector<2x8x8xf32>
    %53 = arith.mulf %51, %52 : vector<2x8x8xf32>
    %cst_24 = arith.constant dense<0xFF800000> : vector<2x8xf32>
    %54 = vector.multi_reduction <maximumf>, %53, %cst_24 [2] : vector<2x8x8xf32> to vector<2x8xf32>
    %55 = vector.shape_cast %54 : vector<2x8xf32> to vector<2x8x1xf32>
    %56 = vector.broadcast %55 : vector<2x8x1xf32> to vector<2x8x8xf32>
    %57 = arith.subf %53, %56 : vector<2x8x8xf32>
    %58 = math.exp %57 : vector<2x8x8xf32>
    %cst_25 = arith.constant dense<0.000000e+00> : vector<2x8xf32>
    %59 = vector.multi_reduction <add>, %58, %cst_25 [2] : vector<2x8x8xf32> to vector<2x8xf32>
    %60 = vector.shape_cast %59 : vector<2x8xf32> to vector<2x8x1xf32>
    %61 = tpu.reciprocal %60 {approx = true} : vector<2x8x1xf32> -> vector<2x8x1xf32>
    %62 = vector.broadcast %61 : vector<2x8x1xf32> to vector<2x8x8xf32>
    %63 = arith.mulf %58, %62 : vector<2x8x8xf32>
    %64 = arith.truncf %63 : vector<2x8x8xf32> to vector<2x8x8xbf16>
    %65 = vector.extract_strided_slice %30 {offsets = [0, 0, 8], sizes = [2, 8, 8], strides = [1, 1, 1]} : vector<2x8x32xbf16> to vector<2x8x8xbf16>
    "tpu.trace_start"() <{level = 10 : i32, message = "bqk,bkd->bqd"}> : () -> ()
    %cst_26 = arith.constant dense<0.000000e+00> : vector<2x8x8xf32>
    %66 = tpu.matmul %64, %65, %cst_26 {dimension_numbers = #tpu.dot_dimension_numbers<[2], [1], [1], [2], [0, 0, 0, 1, 1, 2], [0], [0]>} : vector<2x8x8xbf16>, vector<2x8x8xbf16>, vector<2x8x8xf32> -> vector<2x8x8xf32>
    "tpu.trace_stop"() : () -> ()
    %67 = vector.extract_strided_slice %26 {offsets = [0, 0, 16], sizes = [2, 8, 8], strides = [1, 1, 1]} : vector<2x8x32xbf16> to vector<2x8x8xbf16>
    %68 = vector.extract_strided_slice %28 {offsets = [0, 0, 16], sizes = [2, 8, 8], strides = [1, 1, 1]} : vector<2x8x32xbf16> to vector<2x8x8xbf16>
    "tpu.trace_start"() <{level = 10 : i32, message = "bqd,bkd->bqk"}> : () -> ()
    %cst_27 = arith.constant dense<0.000000e+00> : vector<2x8x8xf32>
    %69 = tpu.matmul %67, %68, %cst_27 {dimension_numbers = #tpu.dot_dimension_numbers<[2], [2], [1], [1], [0, 0, 0, 1, 1, 1], [0], [0]>} : vector<2x8x8xbf16>, vector<2x8x8xbf16>, vector<2x8x8xf32> -> vector<2x8x8xf32>
    "tpu.trace_stop"() : () -> ()
    %cst_28 = arith.constant 0.353553385 : f32
    %70 = vector.broadcast %cst_28 : f32 to vector<2x8x8xf32>
    %71 = arith.mulf %69, %70 : vector<2x8x8xf32>
    %cst_29 = arith.constant dense<0xFF800000> : vector<2x8xf32>
    %72 = vector.multi_reduction <maximumf>, %71, %cst_29 [2] : vector<2x8x8xf32> to vector<2x8xf32>
    %73 = vector.shape_cast %72 : vector<2x8xf32> to vector<2x8x1xf32>
    %74 = vector.broadcast %73 : vector<2x8x1xf32> to vector<2x8x8xf32>
    %75 = arith.subf %71, %74 : vector<2x8x8xf32>
    %76 = math.exp %75 : vector<2x8x8xf32>
    %cst_30 = arith.constant dense<0.000000e+00> : vector<2x8xf32>
    %77 = vector.multi_reduction <add>, %76, %cst_30 [2] : vector<2x8x8xf32> to vector<2x8xf32>
    %78 = vector.shape_cast %77 : vector<2x8xf32> to vector<2x8x1xf32>
    %79 = tpu.reciprocal %78 {approx = true} : vector<2x8x1xf32> -> vector<2x8x1xf32>
    %80 = vector.broadcast %79 : vector<2x8x1xf32> to vector<2x8x8xf32>
    %81 = arith.mulf %76, %80 : vector<2x8x8xf32>
    %82 = arith.truncf %81 : vector<2x8x8xf32> to vector<2x8x8xbf16>
    %83 = vector.extract_strided_slice %30 {offsets = [0, 0, 16], sizes = [2, 8, 8], strides = [1, 1, 1]} : vector<2x8x32xbf16> to vector<2x8x8xbf16>
    "tpu.trace_start"() <{level = 10 : i32, message = "bqk,bkd->bqd"}> : () -> ()
    %cst_31 = arith.constant dense<0.000000e+00> : vector<2x8x8xf32>
    %84 = tpu.matmul %82, %83, %cst_31 {dimension_numbers = #tpu.dot_dimension_numbers<[2], [1], [1], [2], [0, 0, 0, 1, 1, 2], [0], [0]>} : vector<2x8x8xbf16>, vector<2x8x8xbf16>, vector<2x8x8xf32> -> vector<2x8x8xf32>
    "tpu.trace_stop"() : () -> ()
    %85 = vector.extract_strided_slice %26 {offsets = [0, 0, 24], sizes = [2, 8, 8], strides = [1, 1, 1]} : vector<2x8x32xbf16> to vector<2x8x8xbf16>
    %86 = vector.extract_strided_slice %28 {offsets = [0, 0, 24], sizes = [2, 8, 8], strides = [1, 1, 1]} : vector<2x8x32xbf16> to vector<2x8x8xbf16>
    "tpu.trace_start"() <{level = 10 : i32, message = "bqd,bkd->bqk"}> : () -> ()
    %cst_32 = arith.constant dense<0.000000e+00> : vector<2x8x8xf32>
    %87 = tpu.matmul %85, %86, %cst_32 {dimension_numbers = #tpu.dot_dimension_numbers<[2], [2], [1], [1], [0, 0, 0, 1, 1, 1], [0], [0]>} : vector<2x8x8xbf16>, vector<2x8x8xbf16>, vector<2x8x8xf32> -> vector<2x8x8xf32>
    "tpu.trace_stop"() : () -> ()
    %cst_33 = arith.constant 0.353553385 : f32
    %88 = vector.broadcast %cst_33 : f32 to vector<2x8x8xf32>
    %89 = arith.mulf %87, %88 : vector<2x8x8xf32>
    %cst_34 = arith.constant dense<0xFF800000> : vector<2x8xf32>
    %90 = vector.multi_reduction <maximumf>, %89, %cst_34 [2] : vector<2x8x8xf32> to vector<2x8xf32>
    %91 = vector.shape_cast %90 : vector<2x8xf32> to vector<2x8x1xf32>
    %92 = vector.broadcast %91 : vector<2x8x1xf32> to vector<2x8x8xf32>
    %93 = arith.subf %89, %92 : vector<2x8x8xf32>
    %94 = math.exp %93 : vector<2x8x8xf32>
    %cst_35 = arith.constant dense<0.000000e+00> : vector<2x8xf32>
    %95 = vector.multi_reduction <add>, %94, %cst_35 [2] : vector<2x8x8xf32> to vector<2x8xf32>
    %96 = vector.shape_cast %95 : vector<2x8xf32> to vector<2x8x1xf32>
    %97 = tpu.reciprocal %96 {approx = true} : vector<2x8x1xf32> -> vector<2x8x1xf32>
    %98 = vector.broadcast %97 : vector<2x8x1xf32> to vector<2x8x8xf32>
    %99 = arith.mulf %94, %98 : vector<2x8x8xf32>
    %100 = arith.truncf %99 : vector<2x8x8xf32> to vector<2x8x8xbf16>
    %101 = vector.extract_strided_slice %30 {offsets = [0, 0, 24], sizes = [2, 8, 8], strides = [1, 1, 1]} : vector<2x8x32xbf16> to vector<2x8x8xbf16>
    "tpu.trace_start"() <{level = 10 : i32, message = "bqk,bkd->bqd"}> : () -> ()
    %cst_36 = arith.constant dense<0.000000e+00> : vector<2x8x8xf32>
    %102 = tpu.matmul %100, %101, %cst_36 {dimension_numbers = #tpu.dot_dimension_numbers<[2], [1], [1], [2], [0, 0, 0, 1, 1, 2], [0], [0]>} : vector<2x8x8xbf16>, vector<2x8x8xbf16>, vector<2x8x8xf32> -> vector<2x8x8xf32>
    "tpu.trace_stop"() : () -> ()
    %103 = tpu.concatenate %48, %66, %84, %102 in 2 : vector<2x8x8xf32>, vector<2x8x8xf32>, vector<2x8x8xf32>, vector<2x8x8xf32> -> vector<2x8x32xf32>
    %104 = vector.shape_cast %103 : vector<2x8x32xf32> to vector<16x32xf32>
    %105 = arith.truncf %104 : vector<16x32xf32> to vector<16x32xbf16>
    %c0_37 = arith.constant 0 : index
    %c0_38 = arith.constant 0 : index
    %c0_39 = arith.constant 0 : index
    %106 = vector.load %arg7[%c0_37, %c0_38, %c0_39] : memref<1x32x32xbf16, #tpu.memory_space<vmem>>, vector<1x32x32xbf16>
    %107 = vector.shape_cast %106 : vector<1x32x32xbf16> to vector<32x32xbf16>
    %cst_40 = arith.constant dense<0.000000e+00> : vector<16x32xf32>
    %108 = tpu.matmul %105, %107, %cst_40 {dimension_numbers = #tpu.dot_dimension_numbers<[1], [0], [0], [1], [0, 0, 1, 1], [], []>} : vector<16x32xbf16>, vector<32x32xbf16>, vector<16x32xf32> -> vector<16x32xf32>
    %109 = vector.extract_strided_slice %6 {offsets = [3, 0], sizes = [1, 32], strides = [1, 1]} : vector<9x32xf32> to vector<1x32xf32>
    %110 = vector.broadcast %109 : vector<1x32xf32> to vector<16x32xf32>
    %111 = arith.addf %108, %110 : vector<16x32xf32>
    %112 = arith.addf %3, %111 : vector<16x32xf32>
    %113 = vector.extract_strided_slice %6 {offsets = [4, 0], sizes = [1, 32], strides = [1, 1]} : vector<9x32xf32> to vector<1x32xf32>
    %114 = vector.extract_strided_slice %6 {offsets = [5, 0], sizes = [1, 32], strides = [1, 1]} : vector<9x32xf32> to vector<1x32xf32>
    %cst_41 = arith.constant dense<0.000000e+00> : vector<16xf32>
    %115 = vector.multi_reduction <add>, %112, %cst_41 [1] : vector<16x32xf32> to vector<16xf32>
    %116 = vector.shape_cast %115 : vector<16xf32> to vector<16x1xf32>
    %cst_42 = arith.constant 3.200000e+01 : f32
    %117 = vector.broadcast %cst_42 : f32 to vector<16x1xf32>
    %118 = arith.divf %116, %117 : vector<16x1xf32>
    %119 = vector.broadcast %118 : vector<16x1xf32> to vector<16x32xf32>
    %120 = arith.subf %112, %119 : vector<16x32xf32>
    %121 = arith.mulf %120, %120 : vector<16x32xf32>
    %cst_43 = arith.constant dense<0.000000e+00> : vector<16xf32>
    %122 = vector.multi_reduction <add>, %121, %cst_43 [1] : vector<16x32xf32> to vector<16xf32>
    %123 = vector.shape_cast %122 : vector<16xf32> to vector<16x1xf32>
    %cst_44 = arith.constant 3.200000e+01 : f32
    %124 = vector.broadcast %cst_44 : f32 to vector<16x1xf32>
    %125 = arith.divf %123, %124 : vector<16x1xf32>
    %cst_45 = arith.constant 9.99999974E-6 : f32
    %126 = vector.broadcast %cst_45 : f32 to vector<16x1xf32>
    %127 = arith.addf %125, %126 : vector<16x1xf32>
    %128 = math.rsqrt %127 : vector<16x1xf32>
    %129 = vector.broadcast %128 : vector<16x1xf32> to vector<16x32xf32>
    %130 = arith.mulf %120, %129 : vector<16x32xf32>
    %131 = vector.broadcast %113 : vector<1x32xf32> to vector<16x32xf32>
    %132 = arith.mulf %130, %131 : vector<16x32xf32>
    %133 = vector.broadcast %114 : vector<1x32xf32> to vector<16x32xf32>
    %134 = arith.addf %132, %133 : vector<16x32xf32>
    %135 = arith.truncf %134 : vector<16x32xf32> to vector<16x32xbf16>
    %c0_46 = arith.constant 0 : index
    %c0_47 = arith.constant 0 : index
    %c0_48 = arith.constant 0 : index
    %136 = vector.load %arg8[%c0_46, %c0_47, %c0_48] : memref<1x32x128xbf16, #tpu.memory_space<vmem>>, vector<1x32x128xbf16>
    %137 = vector.shape_cast %136 : vector<1x32x128xbf16> to vector<32x128xbf16>
    %cst_49 = arith.constant dense<0.000000e+00> : vector<16x128xf32>
    %138 = tpu.matmul %135, %137, %cst_49 {dimension_numbers = #tpu.dot_dimension_numbers<[1], [0], [0], [1], [0, 0, 1, 1], [], []>} : vector<16x32xbf16>, vector<32x128xbf16>, vector<16x128xf32> -> vector<16x128xf32>
    %c0_50 = arith.constant 0 : index
    %c0_51 = arith.constant 0 : index
    %c0_52 = arith.constant 0 : index
    %139 = vector.load %arg11[%c0_50, %c0_51, %c0_52] : memref<1x1x128xf32, #tpu.memory_space<vmem>>, vector<1x1x128xf32>
    %140 = vector.shape_cast %139 : vector<1x1x128xf32> to vector<1x128xf32>
    %141 = vector.broadcast %140 : vector<1x128xf32> to vector<16x128xf32>
    %142 = arith.addf %138, %141 : vector<16x128xf32>
    %cst_53 = arith.constant 5.000000e-01 : f32
    %143 = vector.broadcast %cst_53 : f32 to vector<16x128xf32>
    %144 = arith.mulf %143, %142 : vector<16x128xf32>
    %cst_54 = arith.constant 0.707106769 : f32
    %145 = vector.broadcast %cst_54 : f32 to vector<16x128xf32>
    %146 = arith.mulf %142, %145 : vector<16x128xf32>
    %cst_55 = arith.constant 0.000000e+00 : f32
    %147 = vector.broadcast %cst_55 : f32 to vector<16x128xf32>
    %148 = arith.cmpf oge, %146, %147 : vector<16x128xf32>
    %cst_56 = arith.constant 1.000000e+00 : f32
    %cst_57 = arith.constant -1.000000e+00 : f32
    %149 = vector.broadcast %cst_56 : f32 to vector<16x128xf32>
    %150 = vector.broadcast %cst_57 : f32 to vector<16x128xf32>
    %151 = arith.select %148, %149, %150 : vector<16x128xi1>, vector<16x128xf32>
    %152 = math.absf %146 : vector<16x128xf32>
    %cst_58 = arith.constant 0.327591091 : f32
    %153 = vector.broadcast %cst_58 : f32 to vector<16x128xf32>
    %154 = arith.mulf %153, %152 : vector<16x128xf32>
    %cst_59 = arith.constant 1.000000e+00 : f32
    %155 = vector.broadcast %cst_59 : f32 to vector<16x128xf32>
    %156 = arith.addf %155, %154 : vector<16x128xf32>
    %cst_60 = arith.constant 1.000000e+00 : f32
    %157 = vector.broadcast %cst_60 : f32 to vector<16x128xf32>
    %158 = arith.divf %157, %156 : vector<16x128xf32>
    %cst_61 = arith.constant 1.06140542 : f32
    %159 = vector.broadcast %cst_61 : f32 to vector<16x128xf32>
    %160 = arith.mulf %159, %158 : vector<16x128xf32>
    %cst_62 = arith.constant -1.45315206 : f32
    %161 = vector.broadcast %cst_62 : f32 to vector<16x128xf32>
    %162 = arith.addf %160, %161 : vector<16x128xf32>
    %163 = arith.mulf %162, %158 : vector<16x128xf32>
    %cst_63 = arith.constant 1.42141378 : f32
    %164 = vector.broadcast %cst_63 : f32 to vector<16x128xf32>
    %165 = arith.addf %163, %164 : vector<16x128xf32>
    %166 = arith.mulf %165, %158 : vector<16x128xf32>
    %cst_64 = arith.constant -0.284496725 : f32
    %167 = vector.broadcast %cst_64 : f32 to vector<16x128xf32>
    %168 = arith.addf %166, %167 : vector<16x128xf32>
    %169 = arith.mulf %168, %158 : vector<16x128xf32>
    %cst_65 = arith.constant 0.254829586 : f32
    %170 = vector.broadcast %cst_65 : f32 to vector<16x128xf32>
    %171 = arith.addf %169, %170 : vector<16x128xf32>
    %172 = arith.mulf %171, %158 : vector<16x128xf32>
    %cst_66 = arith.constant 0.000000e+00 : f32
    %173 = vector.broadcast %cst_66 : f32 to vector<16x128xf32>
    %174 = arith.subf %173, %152 : vector<16x128xf32>
    %175 = arith.mulf %174, %152 : vector<16x128xf32>
    %176 = math.exp %175 : vector<16x128xf32>
    %177 = arith.mulf %172, %176 : vector<16x128xf32>
    %cst_67 = arith.constant 1.000000e+00 : f32
    %178 = vector.broadcast %cst_67 : f32 to vector<16x128xf32>
    %179 = arith.subf %178, %177 : vector<16x128xf32>
    %180 = arith.mulf %151, %179 : vector<16x128xf32>
    %cst_68 = arith.constant 1.000000e+00 : f32
    %181 = vector.broadcast %cst_68 : f32 to vector<16x128xf32>
    %182 = arith.addf %181, %180 : vector<16x128xf32>
    %183 = arith.mulf %144, %182 : vector<16x128xf32>
    %184 = arith.truncf %183 : vector<16x128xf32> to vector<16x128xbf16>
    %c0_69 = arith.constant 0 : index
    %c0_70 = arith.constant 0 : index
    %c0_71 = arith.constant 0 : index
    %185 = vector.load %arg9[%c0_69, %c0_70, %c0_71] : memref<1x128x32xbf16, #tpu.memory_space<vmem>>, vector<1x128x32xbf16>
    %186 = vector.shape_cast %185 : vector<1x128x32xbf16> to vector<128x32xbf16>
    %cst_72 = arith.constant dense<0.000000e+00> : vector<16x32xf32>
    %187 = tpu.matmul %184, %186, %cst_72 {dimension_numbers = #tpu.dot_dimension_numbers<[1], [0], [0], [1], [0, 0, 1, 1], [], []>} : vector<16x128xbf16>, vector<128x32xbf16>, vector<16x32xf32> -> vector<16x32xf32>
    %188 = vector.extract_strided_slice %6 {offsets = [6, 0], sizes = [1, 32], strides = [1, 1]} : vector<9x32xf32> to vector<1x32xf32>
    %189 = vector.broadcast %188 : vector<1x32xf32> to vector<16x32xf32>
    %190 = arith.addf %187, %189 : vector<16x32xf32>
    %191 = arith.addf %134, %190 : vector<16x32xf32>
    %192 = vector.extract_strided_slice %6 {offsets = [7, 0], sizes = [1, 32], strides = [1, 1]} : vector<9x32xf32> to vector<1x32xf32>
    %193 = vector.extract_strided_slice %6 {offsets = [8, 0], sizes = [1, 32], strides = [1, 1]} : vector<9x32xf32> to vector<1x32xf32>
    %cst_73 = arith.constant dense<0.000000e+00> : vector<16xf32>
    %194 = vector.multi_reduction <add>, %191, %cst_73 [1] : vector<16x32xf32> to vector<16xf32>
    %195 = vector.shape_cast %194 : vector<16xf32> to vector<16x1xf32>
    %cst_74 = arith.constant 3.200000e+01 : f32
    %196 = vector.broadcast %cst_74 : f32 to vector<16x1xf32>
    %197 = arith.divf %195, %196 : vector<16x1xf32>
    %198 = vector.broadcast %197 : vector<16x1xf32> to vector<16x32xf32>
    %199 = arith.subf %191, %198 : vector<16x32xf32>
    %200 = arith.mulf %199, %199 : vector<16x32xf32>
    %cst_75 = arith.constant dense<0.000000e+00> : vector<16xf32>
    %201 = vector.multi_reduction <add>, %200, %cst_75 [1] : vector<16x32xf32> to vector<16xf32>
    %202 = vector.shape_cast %201 : vector<16xf32> to vector<16x1xf32>
    %cst_76 = arith.constant 3.200000e+01 : f32
    %203 = vector.broadcast %cst_76 : f32 to vector<16x1xf32>
    %204 = arith.divf %202, %203 : vector<16x1xf32>
    %cst_77 = arith.constant 9.99999974E-6 : f32
    %205 = vector.broadcast %cst_77 : f32 to vector<16x1xf32>
    %206 = arith.addf %204, %205 : vector<16x1xf32>
    %207 = math.rsqrt %206 : vector<16x1xf32>
    %208 = vector.broadcast %207 : vector<16x1xf32> to vector<16x32xf32>
    %209 = arith.mulf %199, %208 : vector<16x32xf32>
    %210 = vector.broadcast %192 : vector<1x32xf32> to vector<16x32xf32>
    %211 = arith.mulf %209, %210 : vector<16x32xf32>
    %212 = vector.broadcast %193 : vector<1x32xf32> to vector<16x32xf32>
    %213 = arith.addf %211, %212 : vector<16x32xf32>
    %c0_78 = arith.constant 0 : index
    %c0_79 = arith.constant 0 : index
    %214 = vector.load %arg15[%c0_78, %c0_79] : memref<16x32xf32, #tpu.memory_space<vmem>>, vector<16x32xf32>
    tpu.vector_store %arg15[%c0_78, %c0_79], %213 {strides = array<i32>} : memref<16x32xf32, #tpu.memory_space<vmem>>, vector<16x32xf32>,
    %c1_i32 = arith.constant 1 : i32
    %215 = arith.cmpi eq, %arg1, %c1_i32 : i32
    %216 = arith.extui %215 : i1 to i32
    %c0_i32_80 = arith.constant 0 : i32
    %217 = arith.cmpi ne, %216, %c0_i32_80 : i32
    scf.if %217 {
      %c0_81 = arith.constant 0 : index
      %c0_82 = arith.constant 0 : index
      %218 = vector.load %arg12[%c0_81, %c0_82] : memref<1x32xf32, #tpu.memory_space<vmem>>, vector<1x32xf32>
      "tpu.trace_start"() <{level = 10 : i32, message = "oh,nh->on"}> : () -> ()
      %cst_83 = arith.constant dense<0.000000e+00> : vector<1x16xf32>
      %219 = tpu.matmul %218, %213, %cst_83 {dimension_numbers = #tpu.dot_dimension_numbers<[1], [1], [0], [0], [0, 0, 1, 0], [], []>} : vector<1x32xf32>, vector<16x32xf32>, vector<1x16xf32> -> vector<1x16xf32>
      "tpu.trace_stop"() : () -> ()
      %c0_84 = arith.constant 0 : index
      %c0_85 = arith.constant 0 : index
      %220 = vector.load %arg13[%c0_84, %c0_85] : memref<1x1xf32, #tpu.memory_space<vmem>>, vector<1x1xf32>
      %221 = vector.broadcast %220 : vector<1x1xf32> to vector<1x16xf32>
      %222 = arith.addf %219, %221 : vector<1x16xf32>
      %cst_86 = arith.constant 0.000000e+00 : f32
      %223 = vector.broadcast %cst_86 : f32 to vector<1x16xf32>
      %224 = arith.subf %223, %222 : vector<1x16xf32>
      %225 = math.exp %224 : vector<1x16xf32>
      %cst_87 = arith.constant 1.000000e+00 : f32
      %226 = vector.broadcast %cst_87 : f32 to vector<1x16xf32>
      %227 = arith.addf %226, %225 : vector<1x16xf32>
      %cst_88 = arith.constant 1.000000e+00 : f32
      %228 = vector.broadcast %cst_88 : f32 to vector<1x16xf32>
      %229 = arith.divf %228, %227 : vector<1x16xf32>
      %c0_89 = arith.constant 0 : index
      %c0_90 = arith.constant 0 : index
      %230 = vector.load %arg14[%c0_89, %c0_90] : memref<1x16xf32, #tpu.memory_space<vmem>>, vector<1x16xf32>
      tpu.vector_store %arg14[%c0_89, %c0_90], %229 {strides = array<i32>} : memref<1x16xf32, #tpu.memory_space<vmem>>, vector<1x16xf32>,
    } else {
    }
    return
  }
  func.func @transform_0(%arg0: i32, %arg1: i32) -> (i32, i32) {
    %c0_i32 = arith.constant 0 : i32
    %c0_i32_0 = arith.constant 0 : i32
    return %arg0, %c0_i32 : i32, i32
  }
  func.func @transform_1(%arg0: i32, %arg1: i32) -> (i32, i32) {
    %c0_i32 = arith.constant 0 : i32
    %c0_i32_0 = arith.constant 0 : i32
    %c0_i32_1 = arith.constant 0 : i32
    return %c0_i32, %c0_i32_0 : i32, i32
  }
  func.func @transform_2(%arg0: i32, %arg1: i32) -> (i32, i32) {
    %c0_i32 = arith.constant 0 : i32
    %c0_i32_0 = arith.constant 0 : i32
    %c0_i32_1 = arith.constant 0 : i32
    return %c0_i32, %c0_i32_0 : i32, i32
  }
  func.func @transform_3(%arg0: i32, %arg1: i32) -> (i32, i32) {
    %c0_i32 = arith.constant 0 : i32
    %c0_i32_0 = arith.constant 0 : i32
    %c0_i32_1 = arith.constant 0 : i32
    return %c0_i32, %c0_i32_0 : i32, i32
  }
  func.func @transform_4(%arg0: i32, %arg1: i32) -> (i32, i32, i32, i32) {
    %c0_i32 = arith.constant 0 : i32
    %c0_i32_0 = arith.constant 0 : i32
    %c0_i32_1 = arith.constant 0 : i32
    %c0_i32_2 = arith.constant 0 : i32
    return %arg1, %c0_i32, %c0_i32_0, %c0_i32_1 : i32, i32, i32, i32
  }
  func.func @transform_5(%arg0: i32, %arg1: i32) -> (i32, i32, i32) {
    %c0_i32 = arith.constant 0 : i32
    %c0_i32_0 = arith.constant 0 : i32
    %c0_i32_1 = arith.constant 0 : i32
    return %arg1, %c0_i32, %c0_i32_0 : i32, i32, i32
  }
  func.func @transform_6(%arg0: i32, %arg1: i32) -> (i32, i32, i32) {
    %c0_i32 = arith.constant 0 : i32
    %c0_i32_0 = arith.constant 0 : i32
    %c0_i32_1 = arith.constant 0 : i32
    return %arg1, %c0_i32, %c0_i32_0 : i32, i32, i32
  }
  func.func @transform_7(%arg0: i32, %arg1: i32) -> (i32, i32, i32) {
    %c0_i32 = arith.constant 0 : i32
    %c0_i32_0 = arith.constant 0 : i32
    %c0_i32_1 = arith.constant 0 : i32
    return %arg1, %c0_i32, %c0_i32_0 : i32, i32, i32
  }
  func.func @transform_8(%arg0: i32, %arg1: i32) -> (i32, i32, i32) {
    %c0_i32 = arith.constant 0 : i32
    %c0_i32_0 = arith.constant 0 : i32
    %c0_i32_1 = arith.constant 0 : i32
    return %arg1, %c0_i32, %c0_i32_0 : i32, i32, i32
  }
  func.func @transform_9(%arg0: i32, %arg1: i32) -> (i32, i32, i32) {
    %c0_i32 = arith.constant 0 : i32
    %c0_i32_0 = arith.constant 0 : i32
    %c0_i32_1 = arith.constant 0 : i32
    return %arg1, %c0_i32, %c0_i32_0 : i32, i32, i32
  }
  func.func @transform_10(%arg0: i32, %arg1: i32) -> (i32, i32) {
    %c0_i32 = arith.constant 0 : i32
    %c0_i32_0 = arith.constant 0 : i32
    %c0_i32_1 = arith.constant 0 : i32
    return %c0_i32, %c0_i32_0 : i32, i32
  }
  func.func @transform_11(%arg0: i32, %arg1: i32) -> (i32, i32) {
    %c0_i32 = arith.constant 0 : i32
    %c0_i32_0 = arith.constant 0 : i32
    %c0_i32_1 = arith.constant 0 : i32
    return %c0_i32, %c0_i32_0 : i32, i32
  }
  func.func @transform_12(%arg0: i32, %arg1: i32) -> (i32, i32) {
    %c0_i32 = arith.constant 0 : i32
    %c0_i32_0 = arith.constant 0 : i32
    return %c0_i32, %arg0 : i32, i32
  }
}

</mosaic_0001>

<bundles_post_ra>
// kernel: tpu_custom_call.1
= control target key start
LH: loop header
LB: loop body
LE: loop exit
PB: predicated region body
PF: predicated region fallthrough
CT: control target
= control target key end

     0   :  { %s3278_s0 = inlined_call_operand.vmem [shape: f32[16,2], index: 0, kind: input, shape index: {}]   ;;  %s3279_s1 = inlined_call_operand.vmem [shape: f32[8,32], index: 1, kind: input, shape index: {}]   ;;  %s3280_s2 = inlined_call_operand.vmem [shape: f32[2,32], index: 2, kind: input, shape index: {}]   ;;  %s3281_s3 = inlined_call_operand.vmem [shape: f32[1,32], index: 3, kind: input, shape index: {}]   ;;  %s3282_s4 = inlined_call_operand.vmem [shape: bf16[2,3,32,32], index: 4, kind: input, shape index: {}]   ;;  %s3283_s5 = inlined_call_operand.vmem [shape: bf16[2,32,32], index: 5, kind: input, shape index: {}]   ;;  %s3284_s6 = inlined_call_operand.vmem [shape: bf16[2,32,128], index: 6, kind: input, shape index: {}]   ;;  %s3285_s7 = inlined_call_operand.vmem [shape: bf16[2,128,32], index: 7, kind: input, shape index: {}]   ;;  %s3286_s8 = inlined_call_operand.vmem [shape: f32[2,9,32], index: 8, kind: input, shape index: {}]   ;;  %s3287_s9 = inlined_call_operand.vmem [shape: f32[2,1,128], index: 9, kind: input, shape index: {}]   ;;  %s3288_s10 = inlined_call_operand.vmem [shape: f32[1,32], index: 10, kind: input, shape index: {}]   ;;  %s3289_s11 = inlined_call_operand.<no memory space> [shape: f32[1,1], index: 11, kind: input, shape index: {}]   ;;  %s3290_s12 = inlined_call_operand.hbm [shape: f32[1,16], index: 12, kind: output, shape index: {}]  }
   0x1   :  { %3292 = sst [smem:[#allocation9_spill]] %s3283_s5  ;;  %v17_v0 = vstv %s3289_s11 }
   0x2   :  { %18 = vst [vmem:[#allocation3] sm:$0x1] %v17_v0 }
   0x3   :  { %19 = vsyncpa [#allocation5], 0  ;;  %s2892_s23 = smov 0   ;;  %s2894_s24 = smov 0  }
   0x4   :  { %s2896_s25 = smov 0  }
   0x5 LB: > { %3293 = sst [smem:[#allocation7_spill]] %s2803_s24  ;;  %s34_s26 = sadd.s32 1, %s2803_s24  ;;  %s2807_s25 = sphi %s2896_s25, %s25_s25   ;;  %s2803_s24 = sphi %s2894_s24, %s3299_s24   ;;  %s2799_s23 = sphi %s2892_s23, %s3298_s23  }
   0x6   : > { %p35_p0 = scmp.ge.s32.totalorder %s34_s26, 2  ;;  %p2324_p1 = scmp.ge.s32.totalorder %s2807_s25, 1 }
   0x7   : > { %p436_p2 = scmp.lt.s32.totalorder %s2807_s25, 3 }
   0x8   : > { %s3301_s26 = smov (%p35_p0, %s34_s26), 0 }
   0x9   : > { %3294 = sst [smem:[#allocation8_spill]] %s3301_s26  ;;  %p437_p3 = pnand %p2324_p1, %p436_p2 }
   0xa   : > { %p507_p4 = scmp.lt.s32.totalorder (!%p437_p3), %s2799_s23, 1  ;;  %s3295_s5 = sld [smem:[#allocation9_spill]] (!%p437_p3) }
   0xb   : > { %440 = sbr.rel (%p437_p3) target bundleno = 4293 (0x10c5), region = 68  ;;  %p2334_p5 = scmp.ne.s32.totalorder (!%p437_p3), %s2799_s23, 0 }
  0x10   : > { %s2915_s27 = scalar_select %p507_p4, %s2799_s23, 1 }
  0x12   : > { %s2621_s28 = smul.u32 48, %s2915_s27  ;;  %s2395_s29 = sshll.u32 %s2915_s27, 4 }
  0x13   : > { %s2922_s14 = scalar_lea.vmem %s3295_s5, %s2395_s29  ;;  %s2927_s17 = scalar_lea.vmem %s3284_s6, %s2395_s29 }
  0x14   : > { %s2932_s20 = scalar_lea.vmem %s3282_s4, %s2621_s28  ;;  %s2397_s21 = sshll.u32 %s2915_s27, 6 }
  0x15   : > { %s2938_s26 = scalar_lea.vmem %s3285_s7, %s2397_s21  ;;  %s2943_s13 = scalar_lea.vmem %s3286_s8, %s2395_s29 }
  0x16   : > { %s534_s16 = scalar_lea.vmem %s3287_s9, %s2915_s27  ;;  %539 = sbr.rel (%p2334_p5) target bundleno = 166 (0xa6), region = 72 }
  0x1b   : > { %v540_v1 = vld [vmem:[%s3278_s0] sm:$0xff]  ;;  %v2809_v2 = vmov 1   ;;  %v2810_v3 = vmov 0   ;;  %v541_v4 = vld [vmem:[%s3278_s0 + $0x8] sm:$0xff]  ;;  %vm588_vm0 = vcmask 261120  }
  0x1c   : > { %2668 = vset.pattern.permute.xlu1 %v2809_v2  ;;  %2667 = vset.pattern.permute.xlu0 %v2810_v3  ;;  %v2337_v5 = vld [vmem:[%s3280_s2 + $0x1] ss:$0 sm:$0xff]  ;;  %v2335_v6 = vld [vmem:[%s3280_s2] ss:$0 sm:$0xff] }
  0x1d   : > { %570 = vperm.xlu1 %2668, %v540_v1   ;;  %546 = vperm.xlu0 %2667, %v540_v1   ;;  %v2336_v8 = vld [vmem:[%s3281_s3] ss:$0 sm:$0xff] }
  0x1e   : > { %v585_v13 = vld [vmem:[%s3279_s1] sm:$0xff] }
  0x21   : > { %574 = vperm.xlu1 %2668, %v541_v4   ;;  %551 = vperm.xlu0 %2667, %v541_v4  }
  0x25   : > { %2669 = vset.pattern.permute.xlu0 %v2809_v2 }
  0x98   : > { %v571_v7 = vpop.permute.xlu1 %570  ;;  %v547_v9 = vpop.permute.xlu0 %546 }
  0x99   : > { %v581_v10 = vmul.f32 %v2337_v5, %v571_v7  ;;  %v558_v11 = vmul.f32 %v2335_v6, %v547_v9 }
  0x9b   : > { %v566_v12 = vadd.f32 %v2336_v8, %v558_v11 }
  0x9c   : > { %v575_v14 = vpop.permute.xlu1 %574  ;;  %v552_v15 = vpop.permute.xlu0 %551 }
  0x9d   : > { %v583_v16 = vadd.f32 %v581_v10, %v566_v12  ;;  %v559_v17 = vmul.f32 %v2335_v6, %v552_v15  ;;  %v582_v19 = vmul.f32 %v2337_v5, %v575_v14 }
  0x9f   : > { %v586_v18 = vadd.f32 %v585_v13, %v583_v16  ;;  %v567_v20 = vadd.f32 %v2336_v8, %v559_v17 }
  0xa1   : > { %589 = vst.msk [vmem:[#allocation2] sm:$0xff] %vm588_vm0, %v586_v18  ;;  %v584_v21 = vadd.f32 %v582_v19, %v567_v20 }
  0xa3   : > { %v587_v22 = vadd.f32 %v585_v13, %v584_v21 }
  0xa5   : > { %590 = vst.msk [vmem:[#allocation2 + $0x8] sm:$0xff] %vm588_vm0, %v587_v22 }
  0xa6 PF: > { %v2685_v23 = vld [vmem:[%s2932_s20 + $0x8] sm:$0xff]   ;;  %v2811_v24 = vmov 0.0   ;;  %v2686_v25 = vld [vmem:[%s2932_s20] sm:$0xff]   ;;  %vm2812_vm1 = vmmov 0   ;;  %vm616_vm2 = vcmask 261120   ;;  %v2687_v28 = vld [vmem:[%s2932_s20 + $0x18] sm:$0xff]   ;;  %v600_v33 = vlaneseq }
  0xa7   : > { %2458 = vmatprep.subr.bf16.mxu0 %v2811_v24  ;;  %2482 = vmatprep.subr.bf16.mxu1 %v2811_v24  ;;  %v2688_v30 = vld [vmem:[%s2932_s20 + $0x10] sm:$0xff]   ;;  %v2689_v31 = vld [vmem:[%s2932_s20 + $0x28] sm:$0xff]   ;;  %v2690_v32 = vld [vmem:[%s2932_s20 + $0x20] sm:$0xff]   ;;  %vm791_vm3 = vcmask 64512   ;;  %s2813_s20 = smov 120   ;;  %vm913_vm4 = vcmask 1043456  }
  0xa8   : > { %2459 = vmatpush3.bf16.msra.mxu0 %v2685_v23  ;;  %2462 = vmatprep.mubr.msk.bf16.mxu0 %vm2812_vm1, %v2811_v24  ;;  %v2974_v26 = vld [vmem:[#allocation2] sm:$0xff]  ;;  %v3001_v34 = vshrl.u32 %v600_v33, 7  ;;  %s2814_s18 = smov 112   ;;  %s2815_s24 = smov 104   ;;  %vm1701_vm5 = vcmask 130048   ;;  %vm1704_vm6 = vcmask 195584  }
  0xa9   : > { %2460 = vmatprep.subr.bf16.mxu0 %v2811_v24  ;;  %2484 = vmatprep.mubr.msk.bf16.mxu1 %vm2812_vm1, %v2811_v24  ;;  %v3005_v38 = vld [vmem:[%s2943_s13] sm:$0xff]  ;;  %s2816_s11 = smov 8   ;;  %s2817_s5 = smov 16  }
  0xaa   : > { %v668_v36 = vsub.s32 1, %v3001_v34  ;;  %v602_v42 = vsub.s32 0, %v3001_v34  ;;  %v730_v58 = vsub.s32 2, %v3001_v34  ;;  %s2818_s29 = smov 24   ;;  %p2387_p6 = scmp.ne.s32.totalorder %s2799_s23, 1 }
  0xac   : > { %v2976_v27 = vld [vmem:[#allocation2 + $0x8] sm:$0xff]  ;;  %2461 = vmatpush3.bf16.msra.mxu0 %v2686_v25  ;;  %v669_v40 = vrot.slane %v3005_v38, %v668_v36  ;;  %v603_v46 = vrot.slane %v3005_v38, %v602_v42  ;;  %v731_v59 = vrot.slane %v3005_v38, %v730_v58 }
  0xad   : > { %v593_v29 = vpack.c.bf16 %v2976_v27, %v2974_v26  ;;  %2466 = vmatprep.subr.bf16.mxu0 %v2811_v24 }
  0xaf   : > { %2463 = vmatmul.mubr.msk.bf16.vlgmr.msra.gmra.mxu0 %vm616_vm2, %v593_v29 }
  0xb0   : > { %2467 = vmatpush3.bf16.msra.mxu0 %v2687_v28  ;;  %2470 = vmatprep.mubr.msk.bf16.mxu0 %vm2812_vm1, %v2811_v24 }
  0xb1   : > { %2468 = vmatprep.subr.bf16.mxu0 %v2811_v24 }
  0xb4   : > { %2469 = vmatpush3.bf16.msra.mxu0 %v2688_v30 }
  0xb5   : > { %2474 = vmatprep.subr.bf16.mxu0 %v2811_v24 }
  0xb7   : > { %2471 = vmatmul.mubr.msk.bf16.vlgmr.msra.gmra.mxu0 %vm616_vm2, %v593_v29 }
  0xb8   : > { %2478 = vmatprep.mubr.msk.bf16.mxu0 %vm2812_vm1, %v2811_v24  ;;  %2475 = vmatpush3.bf16.msra.mxu0 %v2689_v31 }
  0xb9   : > { %2476 = vmatprep.subr.bf16.mxu0 %v2811_v24 }
  0xbc   : > { %2477 = vmatpush3.bf16.msra.mxu0 %v2690_v32 }
  0xbd   : > { %2488 = vmatprep.subr.bf16.mxu0 %v2811_v24 }
  0xbf   : > { %2479 = vmatmul.mubr.msk.bf16.vlgmr.msra.gmra.mxu0 %vm616_vm2, %v593_v29 }
  0xc0   : > { %2490 = vmatprep.mubr.msk.bf16.mxu0 %vm2812_vm1, %v2811_v24 }
 0x16f   : > { %v654_v35 = vpop.f32.mrf.mxu0 }
 0x170   : > { %v655_v52 = vadd.f32 %v654_v35, %v603_v46 }
 0x171   : > { %v2464_v37 = vpop.f32.mrf.mxu0 }
 0x172   : > { %v3023_v55 = vpack.c.bf16 %v655_v52, %v655_v52 }
 0x173   : > { %v657_v39 = vpop.f32.mrf.mxu0 }
 0x174   : > { %v658_v56 = vadd.f32 %v657_v39, %v603_v46 }
 0x175   : > { %v2465_v41 = vpop.f32.mrf.mxu0 }
 0x176   : > { %v3030_v57 = vpack.c.bf16 %v658_v56, %v658_v56 }
 0x177   : > { %v716_v43 = vpop.f32.mrf.mxu0 }
 0x178   : > { %v717_v44 = vadd.f32 %v716_v43, %v669_v40 }
 0x179   : > { %v2472_v45 = vpop.f32.mrf.mxu0 }
 0x17a   : > { %v3012_v47 = vpack.c.bf16 %v717_v44, %v717_v44 }
 0x17b   : > { %v719_v48 = vpop.f32.mrf.mxu0 }
 0x17c   : > { %v720_v49 = vadd.f32 %v719_v48, %v669_v40  ;;  %v796_v50 = vsel %vm791_vm3, %v3012_v47, 0 }
 0x17d   : > { %v2473_v51 = vpop.f32.mrf.mxu0  ;;  %2483 = vmatpush3.bf16.xpose.msra.mxu1 %v796_v50 }
 0x17e   : > { %v3016_v53 = vpack.c.bf16 %v720_v49, %v720_v49  ;;  %2494 = vmatprep.subr.bf16.mxu1 %v2811_v24 }
 0x17f   : > { %v778_v60 = vpop.f32.mrf.mxu0 }
 0x180   : > { %1059 = vrot.lane.b32.xlu1 %v3016_v53, %s2813_s20  ;;  %v842_v54 = vsel %vm791_vm3, %v3016_v53, 0  ;;  %v779_v62 = vadd.f32 %v778_v60, %v731_v59 }
 0x181   : > { %2489 = vmatpush3.bf16.xpose.msra.mxu0 %v842_v54  ;;  %v2480_v61 = vpop.f32.mrf.mxu0 }
 0x182   : > { %2500 = vmatprep.subr.bf16.mxu0 %v2811_v24  ;;  %v3038_v2 = vpack.c.bf16 %v779_v62, %v779_v62 }
 0x183   : > { %v781_v63 = vpop.f32.mrf.mxu0 }
 0x184   : > { %2485 = vmatmul.mubr.msk.bf16.vlgmr.msra.gmra.mxu1 %vm791_vm3, %v3023_v55  ;;  %v782_v0 = vadd.f32 %v781_v63, %v731_v59  ;;  %v915_v4 = vsel %vm913_vm4, %v3038_v2, 0 }
 0x185   : > { %2496 = vmatprep.mubr.msk.bf16.mxu1 %vm2812_vm1, %v2811_v24  ;;  %v2481_v1 = vpop.f32.mrf.mxu0  ;;  %2495 = vmatpush3.bf16.msra.mxu1 %v915_v4 }
 0x186   : > { %v3040_v3 = vpack.c.bf16 %v782_v0, %v782_v0  ;;  %2506 = vmatprep.subr.bf16.mxu1 %v2811_v24 }
 0x188   : > { %2491 = vmatmul.mubr.msk.bf16.vlgmr.msra.gmra.mxu0 %vm791_vm3, %v3030_v57  ;;  %v961_v5 = vsel %vm913_vm4, %v3040_v3, 0 }
 0x189   : > { %2502 = vmatprep.mubr.msk.bf16.mxu0 %vm2812_vm1, %v2811_v24  ;;  %2501 = vmatpush3.bf16.msra.mxu0 %v961_v5 }
 0x18a   : > { %2512 = vmatprep.subr.bf16.mxu0 %v2811_v24 }
 0x1f2   : > { %v1060_v31 = vpop.permute.xlu1 %1059 }
 0x1f3   : > { %v1065_v45 = vsel %vm791_vm3, %v1060_v31, 0 }
 0x244   : > { %v832_v6 = vpop.f32.mrf.mxu1 }
 0x245   : > { %v884_v7 = vmul.f32 0.35355338, %v832_v6 }
 0x246   : > { %v2486_v8 = vpop.f32.mrf.mxu1 }
 0x247   : > { %v886_v9 = vsel %vm791_vm3, %v884_v7, -inf }
 0x248   : > { %887 = vmax.xlane.f32.xlu0 %v886_v9  ;;  %v835_v10 = vpop.f32.mrf.mxu1  ;;  %v878_v11 = vpop.f32.mrf.mxu0 }
 0x249   : > { %v885_v12 = vmul.f32 0.35355338, %v878_v11 }
 0x24a   : > { %v2487_v13 = vpop.f32.mrf.mxu1  ;;  %v2492_v14 = vpop.f32.mrf.mxu0 }
 0x24b   : > { %v889_v15 = vsel %vm791_vm3, %v885_v12, -inf }
 0x24c   : > { %890 = vmax.xlane.f32.xlu0 %v889_v15  ;;  %v881_v16 = vpop.f32.mrf.mxu0 }
 0x24e   : > { %v2493_v17 = vpop.f32.mrf.mxu0 }
 0x262   : > { %1007 = vrot.lane.b32.xlu0 %v3012_v47, %s2813_s20 }
 0x2d1   : > { %v888_v18 = vpop.xlane.xlu0 %887 }
 0x2d2   : > { %v892_v19 = vsub.f32 %v884_v7, %v888_v18 }
 0x2d4   : > { %v894_v20 = vmul.f32 1.442695, %v892_v19 }
 0x2d5   : > { %v891_v21 = vpop.xlane.xlu0 %890 }
 0x2d6   : > { %2703 = vpow2.f32 %v894_v20  ;;  %v893_v22 = vsub.f32 %v885_v12, %v891_v21 }
 0x2d8   : > { %v896_v23 = vmul.f32 1.442695, %v893_v22 }
 0x2d9   : > { %v1008_v37 = vpop.permute.xlu0 %1007 }
 0x2da   : > { %2705 = vpow2.f32 %v896_v23  ;;  %v1013_v41 = vsel %vm791_vm3, %v1008_v37, 0 }
 0x2e3   : > { %v2704_v25 = vpop.eup %2703 }
 0x2e4   : > { %v898_v28 = vsel %vm791_vm3, %v2704_v25, 0.0 }
 0x2e5   : > { %899 = vadd.xlane.f32.xlu1 %v898_v28 }
 0x2e7   : > { %v2706_v29 = vpop.eup %2705 }
 0x2e8   : > { %v901_v30 = vsel %vm791_vm3, %v2706_v29, 0.0 }
 0x2e9   : > { %902 = vadd.xlane.f32.xlu1 %v901_v30 }
 0x2fa   : > { %1004 = vrot.lane.b32.xlu1 %v3023_v55, %s2813_s20 }
 0x2fe   : > { %1056 = vrot.lane.b32.xlu1 %v3030_v57, %s2813_s20 }
 0x36e   : > { %v900_v32 = vpop.xlane.xlu1 %899 }
 0x36f   : > { %2707 = vrcp.f32 %v900_v32 }
 0x372   : > { %v903_v33 = vpop.xlane.xlu1 %902 }
 0x373   : > { %2709 = vrcp.f32 %v903_v33 }
 0x376   : > { %v1005_v46 = vpop.permute.xlu1 %1004 }
 0x37a   : > { %v1057_v48 = vpop.permute.xlu1 %1056 }
 0x37c   : > { %v2708_v35 = vpop.eup %2707 }
 0x37d   : > { %v906_v36 = vmul.f32 %v2708_v35, %v2704_v25 }
 0x37f   : > { %v908_v39 = vpack.c.bf16 %v906_v36, %v906_v36 }
 0x380   : > { %v2710_v40 = vpop.eup %2709 }
 0x381   : > { %2497 = vmatmul.mubr.msk.bf16.vlgmr.msra.gmra.mxu1 %vm791_vm3, %v908_v39  ;;  %v907_v43 = vmul.f32 %v2710_v40, %v2706_v29 }
 0x382   : > { %2507 = vmatpush3.bf16.xpose.msra.mxu1 %v1013_v41  ;;  %2508 = vmatprep.mubr.msk.bf16.mxu1 %vm2812_vm1, %v2811_v24 }
 0x383   : > { %v909_v44 = vpack.c.bf16 %v907_v43, %v907_v43  ;;  %2518 = vmatprep.subr.bf16.mxu1 %v2811_v24 }
 0x385   : > { %2503 = vmatmul.mubr.msk.bf16.vlgmr.msra.gmra.mxu0 %vm791_vm3, %v909_v44 }
 0x386   : > { %2513 = vmatpush3.bf16.xpose.msra.mxu0 %v1065_v45  ;;  %2514 = vmatprep.mubr.msk.bf16.mxu0 %vm2812_vm1, %v2811_v24 }
 0x387   : > { %2524 = vmatprep.subr.bf16.mxu0 %v2811_v24 }
 0x389   : > { %2509 = vmatmul.mubr.msk.bf16.vlgmr.msra.gmra.mxu1 %vm791_vm3, %v1005_v46 }
 0x38a   : > { %2520 = vmatprep.mubr.msk.bf16.mxu1 %vm2812_vm1, %v2811_v24 }
 0x38d   : > { %2515 = vmatmul.mubr.msk.bf16.vlgmr.msra.gmra.mxu0 %vm791_vm3, %v1057_v48 }
 0x38e   : > { %2526 = vmatprep.mubr.msk.bf16.mxu0 %vm2812_vm1, %v2811_v24 }
 0x441   : > { %v3074_v49 = vpop.f32.mrf.mxu1 }
 0x443   : > { %v2498_v50 = vpop.f32.mrf.mxu1 }
 0x445   : > { %v954_v51 = vpop.f32.mrf.mxu1  ;;  %v3076_v52 = vpop.f32.mrf.mxu0 }
 0x447   : > { %v2499_v54 = vpop.f32.mrf.mxu1  ;;  %v2504_v56 = vpop.f32.mrf.mxu0 }
 0x449   : > { %v1000_v58 = vpop.f32.mrf.mxu0  ;;  %v1049_v59 = vpop.f32.mrf.mxu1 }
 0x44a   : > { %v1107_v60 = vmul.f32 0.35355338, %v1049_v59 }
 0x44b   : > { %v2505_v61 = vpop.f32.mrf.mxu0  ;;  %v2510_v62 = vpop.f32.mrf.mxu1 }
 0x44c   : > { %v1109_v63 = vsel %vm791_vm3, %v1107_v60, -inf }
 0x44d   : > { %1110 = vmax.xlane.f32.xlu0 %v1109_v63  ;;  %v1052_v0 = vpop.f32.mrf.mxu1  ;;  %v1101_v1 = vpop.f32.mrf.mxu0 }
 0x44e   : > { %v1108_v4 = vmul.f32 0.35355338, %v1101_v1 }
 0x44f   : > { %v2511_v5 = vpop.f32.mrf.mxu1  ;;  %v2516_v6 = vpop.f32.mrf.mxu0 }
 0x450   : > { %v1112_v7 = vsel %vm791_vm3, %v1108_v4, -inf }
 0x451   : > { %1113 = vmax.xlane.f32.xlu1 %v1112_v7  ;;  %v1104_v8 = vpop.f32.mrf.mxu0 }
 0x453   : > { %v2517_v9 = vpop.f32.mrf.mxu0 }
 0x462   : > { %1183 = vrot.lane.b32.xlu1 %v3040_v3, %s2813_s20 }
 0x466   : > { %1233 = vrot.lane.b32.xlu1 %v3012_v47, %s2814_s18 }
 0x46a   : > { %1283 = vrot.lane.b32.xlu1 %v3016_v53, %s2814_s18 }
 0x46e   : > { %1281 = vrot.lane.b32.xlu1 %v3030_v57, %s2814_s18 }
 0x4d6   : > { %v1111_v10 = vpop.xlane.xlu0 %1110 }
 0x4d7   : > { %v1115_v11 = vsub.f32 %v1107_v60, %v1111_v10 }
 0x4d9   : > { %v1117_v12 = vmul.f32 1.442695, %v1115_v11 }
 0x4da   : > { %v1114_v13 = vpop.xlane.xlu1 %1113 }
 0x4db   : > { %2711 = vpow2.f32 %v1117_v12  ;;  %v1116_v14 = vsub.f32 %v1108_v4, %v1114_v13 }
 0x4dd   : > { %v1119_v15 = vmul.f32 1.442695, %v1116_v14 }
 0x4de   : > { %v1184_v16 = vpop.permute.xlu1 %1183 }
 0x4df   : > { %2713 = vpow2.f32 %v1119_v15  ;;  %v1189_v17 = vsel %vm913_vm4, %v1184_v16, 0 }
 0x4e0   : > { %2525 = vmatpush3.bf16.msra.mxu0 %v1189_v17 }
 0x4e1   : > { %2536 = vmatprep.subr.bf16.mxu0 %v2811_v24 }
 0x4e2   : > { %v1234_v30 = vpop.permute.xlu1 %1233 }
 0x4e3   : > { %v1239_v35 = vsel %vm791_vm3, %v1234_v30, 0 }
 0x4e6   : > { %v1284_v37 = vpop.permute.xlu1 %1283 }
 0x4e7   : > { %v1289_v40 = vsel %vm791_vm3, %v1284_v37, 0 }
 0x4e8   : > { %v2712_v18 = vpop.eup %2711 }
 0x4e9   : > { %v1121_v19 = vsel %vm791_vm3, %v2712_v18, 0.0 }
 0x4ea   : > { %1122 = vadd.xlane.f32.xlu0 %v1121_v19  ;;  %v1282_v43 = vpop.permute.xlu1 %1281 }
 0x4ec   : > { %v2714_v20 = vpop.eup %2713 }
 0x4ed   : > { %v1124_v21 = vsel %vm791_vm3, %v2714_v20, 0.0 }
 0x4ee   : > { %1125 = vadd.xlane.f32.xlu0 %v1124_v21 }
 0x504   : > { %1134 = vrot.lane.b32.xlu0 %v3038_v2, %s2813_s20 }
 0x508   : > { %1231 = vrot.lane.b32.xlu0 %v3023_v55, %s2814_s18 }
 0x573   : > { %v1123_v22 = vpop.xlane.xlu0 %1122 }
 0x574   : > { %2715 = vrcp.f32 %v1123_v22 }
 0x577   : > { %v1126_v23 = vpop.xlane.xlu0 %1125 }
 0x578   : > { %2717 = vrcp.f32 %v1126_v23 }
 0x57b   : > { %v1135_v25 = vpop.permute.xlu0 %1134 }
 0x57c   : > { %v1140_v28 = vsel %vm913_vm4, %v1135_v25, 0 }
 0x57d   : > { %2519 = vmatpush3.bf16.msra.mxu1 %v1140_v28 }
 0x57e   : > { %2530 = vmatprep.subr.bf16.mxu1 %v2811_v24 }
 0x57f   : > { %v1232_v41 = vpop.permute.xlu0 %1231 }
 0x581   : > { %v2716_v29 = vpop.eup %2715 }
 0x582   : > { %v1129_v31 = vmul.f32 %v2716_v29, %v2712_v18 }
 0x584   : > { %v1131_v32 = vpack.c.bf16 %v1129_v31, %v1129_v31 }
 0x585   : > { %v2718_v33 = vpop.eup %2717 }
 0x586   : > { %2521 = vmatmul.mubr.msk.bf16.vlgmr.msra.gmra.mxu1 %vm791_vm3, %v1131_v32  ;;  %v1130_v36 = vmul.f32 %v2718_v33, %v2714_v20 }
 0x587   : > { %2531 = vmatpush3.bf16.xpose.msra.mxu1 %v1239_v35  ;;  %2532 = vmatprep.mubr.msk.bf16.mxu1 %vm2812_vm1, %v2811_v24 }
 0x588   : > { %v1132_v39 = vpack.c.bf16 %v1130_v36, %v1130_v36  ;;  %2542 = vmatprep.subr.bf16.mxu1 %v2811_v24 }
 0x58a   : > { %2527 = vmatmul.mubr.msk.bf16.vlgmr.msra.gmra.mxu0 %vm791_vm3, %v1132_v39 }
 0x58b   : > { %2537 = vmatpush3.bf16.xpose.msra.mxu0 %v1289_v40  ;;  %2538 = vmatprep.mubr.msk.bf16.mxu0 %vm2812_vm1, %v2811_v24 }
 0x58c   : > { %2548 = vmatprep.subr.bf16.mxu0 %v2811_v24 }
 0x58e   : > { %2533 = vmatmul.mubr.msk.bf16.vlgmr.msra.gmra.mxu1 %vm791_vm3, %v1232_v41 }
 0x58f   : > { %2544 = vmatprep.mubr.msk.bf16.mxu1 %vm2812_vm1, %v2811_v24 }
 0x592   : > { %2539 = vmatmul.mubr.msk.bf16.vlgmr.msra.gmra.mxu0 %vm791_vm3, %v1282_v43 }
 0x593   : > { %2550 = vmatprep.mubr.msk.bf16.mxu0 %vm2812_vm1, %v2811_v24 }
 0x646   : > { %v3114_v44 = vpop.f32.mrf.mxu1 }
 0x648   : > { %v2522_v45 = vpop.f32.mrf.mxu1 }
 0x64a   : > { %v1179_v46 = vpop.f32.mrf.mxu1  ;;  %v3116_v48 = vpop.f32.mrf.mxu0 }
 0x64b   : > { %v2670_v50 = vpack.i.bf16 %v3116_v48, %v3114_v44 }
 0x64c   : > { %v2523_v51 = vpop.f32.mrf.mxu1  ;;  %v2528_v54 = vpop.f32.mrf.mxu0 }
 0x64e   : > { %v1228_v56 = vpop.f32.mrf.mxu0  ;;  %v1275_v58 = vpop.f32.mrf.mxu1 }
 0x64f   : > { %v1331_v59 = vmul.f32 0.35355338, %v1275_v58 }
 0x650   : > { %v2529_v60 = vpop.f32.mrf.mxu0  ;;  %v2534_v61 = vpop.f32.mrf.mxu1 }
 0x651   : > { %v1333_v62 = vsel %vm791_vm3, %v1331_v59, -inf }
 0x652   : > { %1334 = vmax.xlane.f32.xlu0 %v1333_v62  ;;  %v1278_v63 = vpop.f32.mrf.mxu1  ;;  %v1325_v0 = vpop.f32.mrf.mxu0 }
 0x653   : > { %v1332_v1 = vmul.f32 0.35355338, %v1325_v0 }
 0x654   : > { %v2535_v4 = vpop.f32.mrf.mxu1  ;;  %v2540_v5 = vpop.f32.mrf.mxu0 }
 0x655   : > { %v1336_v6 = vsel %vm791_vm3, %v1332_v1, -inf }
 0x656   : > { %1337 = vmax.xlane.f32.xlu1 %v1336_v6  ;;  %v1328_v7 = vpop.f32.mrf.mxu0 }
 0x658   : > { %v2541_v8 = vpop.f32.mrf.mxu0 }
 0x667   : > { %1405 = vrot.lane.b32.xlu1 %v3040_v3, %s2814_s18 }
 0x66b   : > { %1455 = vrot.lane.b32.xlu1 %v3012_v47, %s2815_s24 }
 0x66f   : > { %1505 = vrot.lane.b32.xlu1 %v3016_v53, %s2815_s24 }
 0x673   : > { %1503 = vrot.lane.b32.xlu1 %v3030_v57, %s2815_s24 }
 0x6db   : > { %v1335_v9 = vpop.xlane.xlu0 %1334 }
 0x6dc   : > { %v1339_v10 = vsub.f32 %v1331_v59, %v1335_v9 }
 0x6de   : > { %v1341_v11 = vmul.f32 1.442695, %v1339_v10 }
 0x6df   : > { %v1338_v12 = vpop.xlane.xlu1 %1337 }
 0x6e0   : > { %2719 = vpow2.f32 %v1341_v11  ;;  %v1340_v13 = vsub.f32 %v1332_v1, %v1338_v12 }
 0x6e2   : > { %v1343_v14 = vmul.f32 1.442695, %v1340_v13 }
 0x6e3   : > { %v1406_v15 = vpop.permute.xlu1 %1405 }
 0x6e4   : > { %2721 = vpow2.f32 %v1343_v14  ;;  %v1411_v16 = vsel %vm913_vm4, %v1406_v15, 0 }
 0x6e5   : > { %2549 = vmatpush3.bf16.msra.mxu0 %v1411_v16 }
 0x6e6   : > { %2560 = vmatprep.subr.bf16.mxu0 %v2811_v24 }
 0x6e7   : > { %v1456_v23 = vpop.permute.xlu1 %1455 }
 0x6e8   : > { %v1461_v30 = vsel %vm791_vm3, %v1456_v23, 0 }
 0x6eb   : > { %v1506_v31 = vpop.permute.xlu1 %1505 }
 0x6ec   : > { %v1511_v33 = vsel %vm791_vm3, %v1506_v31, 0 }
 0x6ed   : > { %v2720_v47 = vpop.eup %2719 }
 0x6ee   : > { %v1345_v53 = vsel %vm791_vm3, %v2720_v47, 0.0 }
 0x6ef   : > { %1346 = vadd.xlane.f32.xlu0 %v1345_v53  ;;  %v1504_v36 = vpop.permute.xlu1 %1503 }
 0x6f1   : > { %v2722_v17 = vpop.eup %2721 }
 0x6f2   : > { %v1348_v57 = vsel %vm791_vm3, %v2722_v17, 0.0 }
 0x6f3   : > { %1349 = vadd.xlane.f32.xlu0 %v1348_v57 }
 0x709   : > { %1357 = vrot.lane.b32.xlu0 %v3038_v2, %s2814_s18 }
 0x70d   : > { %1453 = vrot.lane.b32.xlu0 %v3023_v55, %s2815_s24 }
 0x778   : > { %v1347_v18 = vpop.xlane.xlu0 %1346 }
 0x779   : > { %2723 = vrcp.f32 %v1347_v18 }
 0x77c   : > { %v1350_v19 = vpop.xlane.xlu0 %1349 }
 0x77d   : > { %2725 = vrcp.f32 %v1350_v19 }
 0x780   : > { %v1358_v20 = vpop.permute.xlu0 %1357 }
 0x781   : > { %v1363_v21 = vsel %vm913_vm4, %v1358_v20, 0 }
 0x782   : > { %2543 = vmatpush3.bf16.msra.mxu1 %v1363_v21  ;;  %v2691_v21 = vld [vmem:[%s2922_s14 + $0x8] sm:$0xff]  }
 0x783   : > { %2554 = vmatprep.subr.bf16.mxu1 %v2811_v24 }
 0x784   : > { %v1454_v35 = vpop.permute.xlu0 %1453 }
 0x786   : > { %v2724_v22 = vpop.eup %2723 }
 0x787   : > { %v1353_v25 = vmul.f32 %v2724_v22, %v2720_v47  ;;  %v2692_v22 = vld [vmem:[%s2922_s14] sm:$0xff]  }
 0x789   : > { %v1355_v28 = vpack.c.bf16 %v1353_v25, %v1353_v25 }
 0x78a   : > { %v2726_v29 = vpop.eup %2725 }
 0x78b   : > { %2545 = vmatmul.mubr.msk.bf16.vlgmr.msra.gmra.mxu1 %vm791_vm3, %v1355_v28  ;;  %v1354_v55 = vmul.f32 %v2726_v29, %v2722_v17 }
 0x78c   : > { %2555 = vmatpush3.bf16.xpose.msra.mxu1 %v1461_v30  ;;  %2556 = vmatprep.mubr.msk.bf16.mxu1 %vm2812_vm1, %v2811_v24 }
 0x78d   : > { %v1356_v32 = vpack.c.bf16 %v1354_v55, %v1354_v55  ;;  %2566 = vmatprep.subr.bf16.mxu1 %v2811_v24 }
 0x78f   : > { %2551 = vmatmul.mubr.msk.bf16.vlgmr.msra.gmra.mxu0 %vm791_vm3, %v1356_v32 }
 0x790   : > { %2561 = vmatpush3.bf16.xpose.msra.mxu0 %v1511_v33  ;;  %2562 = vmatprep.mubr.msk.bf16.mxu0 %vm2812_vm1, %v2811_v24 }
 0x791   : > { %2572 = vmatprep.subr.bf16.mxu0 %v2811_v24 }
 0x793   : > { %2557 = vmatmul.mubr.msk.bf16.vlgmr.msra.gmra.mxu1 %vm791_vm3, %v1454_v35 }
 0x794   : > { %2568 = vmatprep.mubr.msk.bf16.mxu1 %vm2812_vm1, %v2811_v24 }
 0x797   : > { %2563 = vmatmul.mubr.msk.bf16.vlgmr.msra.gmra.mxu0 %vm791_vm3, %v1504_v36 }
 0x798   : > { %2574 = vmatprep.mubr.msk.bf16.mxu0 %vm2812_vm1, %v2811_v24 }
 0x84b   : > { %v1399_v37 = vpop.f32.mrf.mxu1 }
 0x84d   : > { %v2546_v39 = vpop.f32.mrf.mxu1 }
 0x84f   : > { %v1402_v40 = vpop.f32.mrf.mxu1  ;;  %v1447_v41 = vpop.f32.mrf.mxu0 }
 0x850   : > { %v2675_v6 = vpack.i.bf16 %v1447_v41, %v1399_v37 }
 0x851   : > { %v2547_v43 = vpop.f32.mrf.mxu1  ;;  %v2552_v45 = vpop.f32.mrf.mxu0 }
 0x853   : > { %v1450_v46 = vpop.f32.mrf.mxu0  ;;  %v1497_v51 = vpop.f32.mrf.mxu1 }
 0x854   : > { %v1553_v54 = vmul.f32 0.35355338, %v1497_v51 }
 0x855   : > { %v2553_v56 = vpop.f32.mrf.mxu0  ;;  %v2558_v58 = vpop.f32.mrf.mxu1 }
 0x856   : > { %v1555_v59 = vsel %vm791_vm3, %v1553_v54, -inf }
 0x857   : > { %1556 = vmax.xlane.f32.xlu0 %v1555_v59  ;;  %v1500_v60 = vpop.f32.mrf.mxu1  ;;  %v1547_v61 = vpop.f32.mrf.mxu0 }
 0x858   : > { %v1554_v62 = vmul.f32 0.35355338, %v1547_v61 }
 0x859   : > { %v2559_v63 = vpop.f32.mrf.mxu1  ;;  %v2564_v0 = vpop.f32.mrf.mxu0 }
 0x85a   : > { %v1558_v1 = vsel %vm791_vm3, %v1554_v62, -inf }
 0x85b   : > { %1559 = vmax.xlane.f32.xlu1 %v1558_v1  ;;  %v1550_v4 = vpop.f32.mrf.mxu0 }
 0x85d   : > { %v2565_v5 = vpop.f32.mrf.mxu0 }
 0x86c   : > { %1627 = vrot.lane.b32.xlu1 %v3040_v3, %s2815_s24 }
 0x870   : > { %2671 = vrot.lane.b32.xlu1 %v2670_v50, %s2816_s11 }
 0x874   : > { %2676 = vrot.lane.b32.xlu1 %v2675_v6, %s2817_s5 }
 0x8e0   : > { %v1557_v7 = vpop.xlane.xlu0 %1556 }
 0x8e1   : > { %v1561_v8 = vsub.f32 %v1553_v54, %v1557_v7 }
 0x8e3   : > { %v1563_v9 = vmul.f32 1.442695, %v1561_v8 }
 0x8e4   : > { %v1560_v10 = vpop.xlane.xlu1 %1559 }
 0x8e5   : > { %2727 = vpow2.f32 %v1563_v9  ;;  %v1562_v11 = vsub.f32 %v1554_v62, %v1560_v10  ;;  %v1714_v62 = vsub.s32 3, %v3001_v34 }
 0x8e7   : > { %v1565_v12 = vmul.f32 1.442695, %v1562_v11  ;;  %v1715_v63 = vrot.slane %v3005_v38, %v1714_v62 }
 0x8e8   : > { %v1628_v13 = vpop.permute.xlu1 %1627 }
 0x8e9   : > { %2729 = vpow2.f32 %v1565_v12  ;;  %v1633_v14 = vsel %vm913_vm4, %v1628_v13, 0 }
 0x8ea   : > { %2573 = vmatpush3.bf16.msra.mxu0 %v1633_v14 }
 0x8eb   : > { %2586 = vmatprep.subr.bf16.mxu0 %v2811_v24 }
 0x8ec   : > { %v2672_v35 = vpop.permute.xlu1 %2671 }
 0x8ed   : > { %v2674_v37 = vunpack.i.h.bf16 %v2672_v35  ;;  %v2673_v39 = vunpack.i.l.bf16 %v2672_v35  ;;  %v2696_v35 = vld [vmem:[%s2938_s26 + $0x30] sm:$0xff]  }
 0x8ef   : > { %v1700_v45 = vsel %vm791_vm3, %v3076_v52, %v2674_v37  ;;  %v1699_v46 = vsel %vm791_vm3, %v3074_v49, %v2673_v39  ;;  %v2698_v37 = vld [vmem:[%s2938_s26 + $0x20] sm:$0xff]   ;;  %v2699_v39 = vld [vmem:[%s2938_s26 + $0x18] sm:$0xff]  }
 0x8f0   : > { %v2677_v36 = vpop.permute.xlu1 %2676 }
 0x8f1   : > { %v2679_v40 = vunpack.i.h.bf16 %v2677_v36  ;;  %v2678_v41 = vunpack.i.l.bf16 %v2677_v36  ;;  %v2697_v36 = vld [vmem:[%s2938_s26 + $0x28] sm:$0xff]  }
 0x8f2   : > { %v2728_v3 = vpop.eup %2727 }
 0x8f3   : > { %v1567_v44 = vsel %vm791_vm3, %v2728_v3, 0.0  ;;  %v1702_v56 = vsel %vm1701_vm5, %v1699_v46, %v2678_v41  ;;  %v1703_v58 = vsel %vm1701_vm5, %v1700_v45, %v2679_v40  ;;  %v2700_v40 = vld [vmem:[%s2938_s26 + $0x10] sm:$0xff]   ;;  %v2701_v41 = vld [vmem:[%s2938_s26 + $0x8] sm:$0xff]   ;;  %v2374_v45 = vld [vmem:[%s534_s16] ss:$0 sm:$0xff] }
 0x8f4   : > { %1568 = vadd.xlane.f32.xlu0 %v1567_v44 }
 0x8f6   : > { %v2730_v48 = vpop.eup %2729 }
 0x8f7   : > { %v1570_v50 = vsel %vm791_vm3, %v2730_v48, 0.0 }
 0x8f8   : > { %1571 = vadd.xlane.f32.xlu0 %v1570_v50 }
 0x90e   : > { %1579 = vrot.lane.b32.xlu0 %v3038_v2, %s2815_s24 }
 0x97d   : > { %v1569_v15 = vpop.xlane.xlu0 %1568 }
 0x97e   : > { %2731 = vrcp.f32 %v1569_v15  ;;  %v2693_v15 = vld [vmem:[%s2927_s17 + $0x8] sm:$0xff]  }
 0x981   : > { %v1572_v16 = vpop.xlane.xlu0 %1571 }
 0x982   : > { %2733 = vrcp.f32 %v1572_v16 }
 0x985   : > { %v1580_v47 = vpop.permute.xlu0 %1579 }
 0x986   : > { %v1585_v53 = vsel %vm913_vm4, %v1580_v47, 0 }
 0x987   : > { %2567 = vmatpush3.bf16.msra.mxu1 %v1585_v53 }
 0x988   : > { %2578 = vmatprep.subr.bf16.mxu1 %v2811_v24 }
 0x98b   : > { %v2732_v17 = vpop.eup %2731 }
 0x98c   : > { %v1575_v57 = vmul.f32 %v2732_v17, %v2728_v3 }
 0x98e   : > { %v1577_v18 = vpack.c.bf16 %v1575_v57, %v1575_v57 }
 0x98f   : > { %v2734_v19 = vpop.eup %2733 }
 0x990   : > { %2569 = vmatmul.mubr.msk.bf16.vlgmr.msra.gmra.mxu1 %vm791_vm3, %v1577_v18  ;;  %v1576_v20 = vmul.f32 %v2734_v19, %v2730_v48  ;;  %v1803_v19 = vsub.s32 4, %v3001_v34 }
 0x991   : > { %2582 = vmatprep.mubr.msk.bf16.mxu1 %vm2812_vm1, %v2811_v24  ;;  %2579 = vmatpush3.bf16.msra.mxu1 %v2691_v21 }
 0x992   : > { %v1578_v2 = vpack.c.bf16 %v1576_v20, %v1576_v20  ;;  %2580 = vmatprep.subr.bf16.mxu1 %v2811_v24  ;;  %v1804_v21 = vrot.slane %v3005_v38, %v1803_v19 }
 0x994   : > { %2575 = vmatmul.mubr.msk.bf16.vlgmr.msra.gmra.mxu0 %vm791_vm3, %v1578_v2 }
 0x995   : > { %2590 = vmatprep.mubr.msk.bf16.mxu0 %vm2812_vm1, %v2811_v24  ;;  %2581 = vmatpush3.bf16.msra.mxu1 %v2692_v22  ;;  %v1809_v22 = vsub.s32 5, %v3001_v34 }
 0x996   : > { %2594 = vmatprep.subr.bf16.mxu1 %v2811_v24  ;;  %2587 = vmatpush3.bf16.msra.mxu0 %v2693_v15 }
 0x997   : > { %2588 = vmatprep.subr.bf16.mxu0 %v2811_v24 }
 0xa50   : > { %v1621_v23 = vpop.f32.mrf.mxu1 }
 0xa52   : > { %v2570_v25 = vpop.f32.mrf.mxu1 }
 0xa54   : > { %v1624_v28 = vpop.f32.mrf.mxu1  ;;  %v1669_v29 = vpop.f32.mrf.mxu0 }
 0xa55   : > { %v2680_v30 = vpack.i.bf16 %v1669_v29, %v1621_v23  ;;  %v1810_v29 = vrot.slane %v3005_v38, %v1809_v22 }
 0xa56   : > { %v2571_v55 = vpop.f32.mrf.mxu1  ;;  %v2576_v31 = vpop.f32.mrf.mxu0 }
 0xa57   : > { %2681 = vrot.lane.b32.xlu0 %v2680_v30, %s2818_s29 }
 0xa58   : > { %v1672_v32 = vpop.f32.mrf.mxu0 }
 0xa5a   : > { %v2577_v33 = vpop.f32.mrf.mxu0 }
 0xa5b   : > { %v2695_v33 = vld [vmem:[%s2938_s26 + $0x38] sm:$0xff]  }
 0xac9   : > { %v2682_v43 = vpop.permute.xlu0 %2681 }
 0xaca   : > { %v2684_v51 = vunpack.i.h.bf16 %v2682_v43  ;;  %v2683_v54 = vunpack.i.l.bf16 %v2682_v43  ;;  %v2702_v43 = vld [vmem:[%s2938_s26] sm:$0xff]  }
 0xacc   : > { %v1706_v59 = vsel %vm1704_vm6, %v1703_v58, %v2684_v51  ;;  %v1705_v60 = vsel %vm1704_vm6, %v1702_v56, %v2683_v54 }
 0xacd   : > { %v1707_v61 = vpack.c.bf16 %v1706_v59, %v1705_v60 }
 0xacf   : > { %2583 = vmatmul.mubr.msk.bf16.vlgmr.msra.gmra.mxu1 %vm616_vm2, %v1707_v61 }
 0xad0   : > { %2610 = vmatprep.mubr.msk.bf16.mxu1 %vm2812_vm1, %v2811_v24  ;;  %2595 = vmatpush3.bf16.msra.mxu1 %v2695_v33 }
 0xad1   : > { %2596 = vmatprep.subr.bf16.mxu1 %v2811_v24 }
 0xad4   : > { %2597 = vmatpush3.bf16.msra.mxu1 %v2696_v35 }
 0xad5   : > { %2598 = vmatprep.subr.bf16.mxu1 %v2811_v24 }
 0xad8   : > { %2599 = vmatpush3.bf16.msra.mxu1 %v2697_v36 }
 0xad9   : > { %2600 = vmatprep.subr.bf16.mxu1 %v2811_v24 }
 0xadc   : > { %2601 = vmatpush3.bf16.msra.mxu1 %v2698_v37 }
 0xadd   : > { %2602 = vmatprep.subr.bf16.mxu1 %v2811_v24 }
 0xae0   : > { %2603 = vmatpush3.bf16.msra.mxu1 %v2699_v39 }
 0xae1   : > { %2604 = vmatprep.subr.bf16.mxu1 %v2811_v24 }
 0xae4   : > { %2605 = vmatpush3.bf16.msra.mxu1 %v2700_v40 }
 0xae5   : > { %2606 = vmatprep.subr.bf16.mxu1 %v2811_v24 }
 0xae8   : > { %2607 = vmatpush3.bf16.msra.mxu1 %v2701_v41 }
 0xae9   : > { %2608 = vmatprep.subr.bf16.mxu1 %v2811_v24 }
 0xaec   : > { %2609 = vmatpush3.bf16.msra.mxu1 %v2702_v43 }
 0xb8f   : > { %v1765_v52 = vpop.f32.mrf.mxu1 }
 0xb90   : > { %v1766_v0 = vadd.f32 %v1765_v52, %v1715_v63 }
 0xb91   : > { %v2584_v1 = vpop.f32.mrf.mxu1 }
 0xb92   : > { %v1772_v49 = vadd.f32 %v1766_v0, %v2974_v26 }
 0xb93   : > { %v1768_v4 = vpop.f32.mrf.mxu1 }
 0xb94   : > { %v1769_v5 = vadd.f32 %v1768_v4, %v1715_v63  ;;  %v1774_v6 = vsel %vm616_vm2, %v1772_v49, 0.0 }
 0xb95   : > { %1775 = vadd.xlane.f32.xlu1 %v1774_v6  ;;  %v2585_v7 = vpop.f32.mrf.mxu1 }
 0xb96   : > { %v1773_v8 = vadd.f32 %v1769_v5, %v2976_v27  ;;  %v2694_v27 = vld [vmem:[%s2927_s17] sm:$0xff]  }
 0xb97   : > { %2589 = vmatpush3.bf16.msra.mxu0 %v2694_v27 }
 0xb98   : > { %v1777_v9 = vsel %vm616_vm2, %v1773_v8, 0.0 }
 0xb99   : > { %1778 = vadd.xlane.f32.xlu0 %v1777_v9 }
 0xc1e   : > { %v1776_v10 = vpop.xlane.xlu1 %1775 }
 0xc1f   : > { %v1781_v11 = vmul.f32 0.03125, %v1776_v10 }
 0xc21   : > { %v1783_v12 = vsub.f32 %v1772_v49, %v1781_v11 }
 0xc22   : > { %v1779_v13 = vpop.xlane.xlu0 %1778 }
 0xc23   : > { %v1782_v14 = vmul.f32 0.03125, %v1779_v13  ;;  %v1785_v3 = vmul.f32 %v1783_v12, %v1783_v12 }
 0xc25   : > { %v1784_v26 = vsub.f32 %v1773_v8, %v1782_v14  ;;  %v1787_v44 = vsel %vm616_vm2, %v1785_v3, 0.0 }
 0xc26   : > { %1788 = vadd.xlane.f32.xlu0 %v1787_v44 }
 0xc27   : > { %v1786_v48 = vmul.f32 %v1784_v26, %v1784_v26 }
 0xc29   : > { %v1790_v50 = vsel %vm616_vm2, %v1786_v48, 0.0 }
 0xc2a   : > { %1791 = vadd.xlane.f32.xlu0 %v1790_v50 }
 0xcaf   : > { %v1789_v16 = vpop.xlane.xlu0 %1788 }
 0xcb0   : > { %v1793_v47 = vmul.f32 0.03125, %v1789_v16 }
 0xcb2   : > { %v1795_v53 = vadd.f32 1e-05, %v1793_v47 }
 0xcb3   : > { %v1792_v17 = vpop.xlane.xlu0 %1791 }
 0xcb4   : > { %2735 = vrsqrt.f32 %v1795_v53  ;;  %v1794_v57 = vmul.f32 0.03125, %v1792_v17 }
 0xcb6   : > { %v1796_v18 = vadd.f32 1e-05, %v1794_v57 }
 0xcb8   : > { %2737 = vrsqrt.f32 %v1796_v18 }
 0xcc1   : > { %v2736_v20 = vpop.eup %2735 }
 0xcc2   : > { %v1799_v2 = vmul.f32 %v2736_v20, %v1783_v12 }
 0xcc4   : > { %v1805_v28 = vmul.f32 %v1804_v21, %v1799_v2 }
 0xcc5   : > { %v2738_v23 = vpop.eup %2737 }
 0xcc6   : > { %v1800_v25 = vmul.f32 %v2738_v23, %v1784_v26  ;;  %v3203_v55 = vadd.f32 %v1810_v29, %v1805_v28  ;;  %v2819_v23 = vmov -1.0  }
 0xcc8   : > { %v1806_v30 = vmul.f32 %v1804_v21, %v1800_v25 }
 0xcca   : > { %v3205_v31 = vadd.f32 %v1810_v29, %v1806_v30 }
 0xccc   : > { %v1813_v32 = vpack.c.bf16 %v3205_v31, %v3203_v55 }
 0xcce   : > { %2591 = vmatmul.mubr.msk.bf16.vlgmr.msra.gmra.mxu0 %vm616_vm2, %v1813_v32 }
 0xd8e   : > { %v1874_v46 = vpop.f32.mrf.mxu0 }
 0xd8f   : > { %v1875_v51 = vadd.f32 %v2374_v45, %v1874_v46 }
 0xd90   : > { %v2592_v54 = vpop.f32.mrf.mxu0 }
 0xd91   : > { %v1883_v56 = vmul.f32 0.70710677, %v1875_v51  ;;  %v1881_v36 = vmul.f32 0.5, %v1875_v51 }
 0xd92   : > { %v1877_v58 = vpop.f32.mrf.mxu0 }
 0xd93   : > { %v1889_v59 = vand.u32 2147483647, %v1883_v56  ;;  %v1878_v60 = vadd.f32 %v2374_v45, %v1877_v58  ;;  %vm1885_vm7 = vcmp.ge.f32.partialorder %v1883_v56, 0.0  ;;  %v1954_v45 = vsub.s32 6, %v3001_v34 }
 0xd94   : > { %v2593_v61 = vpop.f32.mrf.mxu0  ;;  %v1887_v25 = vsel %vm1885_vm7, 1.0, %v2819_v23 }
 0xd95   : > { %v1891_v62 = vmul.f32 0.3275911, %v1889_v59  ;;  %v1884_v63 = vmul.f32 0.70710677, %v1878_v60  ;;  %v1917_v49 = vsub.f32 0.0, %v1889_v59  ;;  %v1882_v37 = vmul.f32 0.5, %v1878_v60 }
 0xd96   : > { %v1955_v46 = vrot.slane %v3005_v38, %v1954_v45 }
 0xd97   : > { %v1893_v52 = vadd.f32 1.0, %v1891_v62  ;;  %v1890_v0 = vand.u32 2147483647, %v1884_v63  ;;  %v1919_v4 = vmul.f32 %v1917_v49, %v1889_v59  ;;  %vm1886_vm8 = vcmp.ge.f32.partialorder %v1884_v63, 0.0 }
 0xd98   : > { %v1888_v32 = vsel %vm1886_vm8, 1.0, %v2819_v23 }
 0xd99   : > { %2739 = vrcp.f32 %v1893_v52  ;;  %v1892_v24 = vmul.f32 0.3275911, %v1890_v0  ;;  %v1918_v5 = vsub.f32 0.0, %v1890_v0  ;;  %v1921_v8 = vmul.f32 1.442695, %v1919_v4 }
 0xd9b   : > { %v1894_v1 = vadd.f32 1.0, %v1892_v24  ;;  %v1920_v9 = vmul.f32 %v1918_v5, %v1890_v0 }
 0xd9d   : > { %2741 = vrcp.f32 %v1894_v1  ;;  %v1923_v14 = vmul.f32 1.442695, %v1920_v9 }
 0xd9e   : > { %2743 = vpow2.f32 %v1921_v8 }
 0xd9f   : > { %2745 = vpow2.f32 %v1923_v14  ;;  %v2751_v14 = vld [vmem:[%s2943_s13] sm:$0xff] }
 0xda6   : > { %v2740_v6 = vpop.eup %2739 }
 0xda7   : > { %v1899_v7 = vmul.f32 1.0614054, %v2740_v6 }
 0xda9   : > { %v1901_v10 = vadd.f32 -1.4531521, %v1899_v7 }
 0xdaa   : > { %v2742_v11 = vpop.eup %2741 }
 0xdab   : > { %v1903_v12 = vmul.f32 %v2740_v6, %v1901_v10  ;;  %v1900_v13 = vmul.f32 1.0614054, %v2742_v11  ;;  %v2744_v18 = vpop.eup %2743 }
 0xdac   : > { %v2746_v22 = vpop.eup %2745 }
 0xdad   : > { %v1905_v3 = vadd.f32 1.4214138, %v1903_v12  ;;  %v1902_v26 = vadd.f32 -1.4531521, %v1900_v13  ;;  %v2075_v13 = vsub.s32 7, %v3001_v34 }
 0xdaf   : > { %v1907_v44 = vmul.f32 %v2740_v6, %v1905_v3  ;;  %v1904_v48 = vmul.f32 %v2742_v11, %v1902_v26  ;;  %v2076_v3 = vrot.slane %v2751_v14, %v2075_v13 }
 0xdb1   : > { %v1909_v50 = vadd.f32 -0.28449672, %v1907_v44  ;;  %v1906_v15 = vadd.f32 1.4214138, %v1904_v48  ;;  %v2386_v48 = vld [vmem:[%s2943_s13 + $0x8] ss:$0 sm:$0xff] }
 0xdb3   : > { %v1911_v27 = vmul.f32 %v2740_v6, %v1909_v50  ;;  %v1908_v16 = vmul.f32 %v2742_v11, %v1906_v15 }
 0xdb5   : > { %v1913_v47 = vadd.f32 0.2548296, %v1911_v27  ;;  %v1910_v53 = vadd.f32 -0.28449672, %v1908_v16 }
 0xdb7   : > { %v1915_v17 = vmul.f32 %v2740_v6, %v1913_v47  ;;  %v1912_v57 = vmul.f32 %v2742_v11, %v1910_v53 }
 0xdb9   : > { %v1925_v19 = vmul.f32 %v2744_v18, %v1915_v17  ;;  %v1914_v20 = vadd.f32 0.2548296, %v1912_v57 }
 0xdbb   : > { %v1927_v2 = vsub.f32 1.0, %v1925_v19  ;;  %v1916_v21 = vmul.f32 %v2742_v11, %v1914_v20 }
 0xdbd   : > { %v1929_v28 = vmul.f32 %v1927_v2, %v1887_v25  ;;  %v1926_v29 = vmul.f32 %v2746_v22, %v1916_v21 }
 0xdbf   : > { %v1928_v30 = vsub.f32 1.0, %v1926_v29  ;;  %v1931_v33 = vadd.f32 1.0, %v1929_v28 }
 0xdc1   : > { %v1930_v35 = vmul.f32 %v1928_v30, %v1888_v32  ;;  %v1933_v40 = vmul.f32 %v1931_v33, %v1881_v36 }
 0xdc3   : > { %v1932_v39 = vadd.f32 1.0, %v1930_v35 }
 0xdc5   : > { %v1934_v41 = vmul.f32 %v1932_v39, %v1882_v37 }
 0xdc7   : > { %v1935_v43 = vpack.c.bf16 %v1934_v41, %v1933_v40 }
 0xdc9   : > { %2611 = vmatmul.mubr.bf16.vlgmr.msra.gmra.mxu1 %v1935_v43 }
 0xe89   : > { %v2038_v54 = vpop.f32.mrf.mxu1 }
 0xe8a   : > { %v2039_v56 = vadd.f32 %v2038_v54, %v1955_v46 }
 0xe8b   : > { %v2612_v58 = vpop.f32.mrf.mxu1 }
 0xe8c   : > { %v2045_v59 = vadd.f32 %v2039_v56, %v3203_v55 }
 0xe8d   : > { %v2041_v61 = vpop.f32.mrf.mxu1 }
 0xe8e   : > { %v2042_v62 = vadd.f32 %v2041_v61, %v1955_v46  ;;  %v2047_v63 = vsel %vm616_vm2, %v2045_v59, 0.0 }
 0xe8f   : > { %2048 = vadd.xlane.f32.xlu1 %v2047_v63  ;;  %v2613_v51 = vpop.f32.mrf.mxu1 }
 0xe90   : > { %v2046_v60 = vadd.f32 %v2042_v62, %v3205_v31 }
 0xe92   : > { %v2050_v52 = vsel %vm616_vm2, %v2046_v60, 0.0 }
 0xe93   : > { %2051 = vadd.xlane.f32.xlu0 %v2050_v52 }
 0xf18   : > { %v2049_v0 = vpop.xlane.xlu1 %2048 }
 0xf19   : > { %v2053_v24 = vmul.f32 0.03125, %v2049_v0 }
 0xf1b   : > { %v2055_v1 = vsub.f32 %v2045_v59, %v2053_v24 }
 0xf1c   : > { %v2052_v38 = vpop.xlane.xlu0 %2051 }
 0xf1d   : > { %v2054_v49 = vmul.f32 0.03125, %v2052_v38  ;;  %v2057_v4 = vmul.f32 %v2055_v1, %v2055_v1 }
 0xf1f   : > { %v2056_v5 = vsub.f32 %v2046_v60, %v2054_v49  ;;  %v2059_v55 = vsel %vm616_vm2, %v2057_v4, 0.0 }
 0xf20   : > { %2060 = vadd.xlane.f32.xlu1 %v2059_v55 }
 0xf21   : > { %v2058_v6 = vmul.f32 %v2056_v5, %v2056_v5 }
 0xf23   : > { %v2062_v7 = vsel %vm616_vm2, %v2058_v6, 0.0 }
 0xf24   : > { %2063 = vadd.xlane.f32.xlu0 %v2062_v7 }
 0xfa9   : > { %v2061_v31 = vpop.xlane.xlu1 %2060 }
 0xfaa   : > { %v2065_v8 = vmul.f32 0.03125, %v2061_v31 }
 0xfac   : > { %v2067_v9 = vadd.f32 1e-05, %v2065_v8 }
 0xfad   : > { %v2064_v10 = vpop.xlane.xlu0 %2063 }
 0xfae   : > { %2747 = vrsqrt.f32 %v2067_v9  ;;  %v2066_v11 = vmul.f32 0.03125, %v2064_v10 }
 0xfb0   : > { %v2068_v12 = vadd.f32 1e-05, %v2066_v11 }
 0xfb2   : > { %2749 = vrsqrt.f32 %v2068_v12 }
 0xfbb   : > { %v2748_v26 = vpop.eup %2747 }
 0xfbc   : > { %v2071_v44 = vmul.f32 %v2748_v26, %v2055_v1 }
 0xfbe   : > { %v2077_v50 = vmul.f32 %v2076_v3, %v2071_v44 }
 0xfbf   : > { %v2750_v15 = vpop.eup %2749 }
 0xfc0   : > { %v2083_v27 = vadd.f32 %v2386_v48, %v2077_v50  ;;  %v2072_v16 = vmul.f32 %v2750_v15, %v2056_v5 }
 0xfc2   : > { %2085 = vst.msk [vmem:[#allocation2] sm:$0xff] %vm616_vm2, %v2083_v27  ;;  %v2078_v47 = vmul.f32 %v2076_v3, %v2072_v16  ;;  %2090 = sbr.rel (%p2387_p6) target bundleno = 4278 (0x10b6), region = 76 }
 0xfc4   : > { %v2084_v53 = vadd.f32 %v2386_v48, %v2078_v47 }
 0xfc6   : > { %2086 = vst.msk [vmem:[#allocation2 + $0x8] sm:$0xff] %vm616_vm2, %v2084_v53 }
 0xfc7   : > { %v2820_v17 = vmov 0.0   ;;  %vm2821_vm9 = vmmov 0   ;;  %v2092_v57 = vld [vmem:[#allocation3] sm:$0x1]  ;;  %v2822_v18 = vmov 0   ;;  %vm2187_vm10 = vcmask 122880  }
 0xfc8   : > { %2614 = vmatprep.subr.mxu0 %v2820_v17  ;;  %2618 = vmatprep.mubr.msk.f32.mxu0 %vm2821_vm9, %v2820_v17  ;;  %v2091_v19 = vld [vmem:[%s3288_s10] sm:$0x1] }
 0xfc9   : > { %2615 = vmatpush3.xpose.msk.msra.mxu0 %vm616_vm2, %v2084_v53  ;;  %2752 = vset.pattern.permute.xlu0 %v2822_v18 }
 0xfca   : > { %2616 = vmatprep.subr.mxu0 %v2820_v17  ;;  %2095 = vperm.xlu0 %2752, %v2092_v57  }
 0xfcd   : > { %2617 = vmatpush3.xpose.msk.msra.mxu0 %vm616_vm2, %v2083_v27 }
 0xfd0   : > { %2619 = vmatmul.mubr.msk.f32.vlgmr.msra.gmra.mxu0 %vm616_vm2, %v2091_v19 }
0x1045   : > { %v2096_v20 = vpop.permute.xlu0 %2095 }
0x1046   : > { %v2101_v2 = vrot.slane %v2096_v20, %v602_v42 }
0x1090   : > { %v2177_v21 = vpop.f32.mrf.mxu0 }
0x1091   : > { %v2178_v22 = vadd.f32 %v2177_v21, %v2101_v2 }
0x1092   : > { %v2620_v23 = vpop.f32.mrf.mxu0 }
0x1093   : > { %v2181_v25 = vsub.f32 0.0, %v2178_v22 }
0x1095   : > { %v2182_v28 = vmul.f32 1.442695, %v2181_v25 }
0x1097   : > { %2753 = vpow2.f32 %v2182_v28 }
0x10a4   : > { %v2754_v29 = vpop.eup %2753 }
0x10a5   : > { %v2184_v30 = vadd.f32 1.0, %v2754_v29 }
0x10a7   : > { %2755 = vrcp.f32 %v2184_v30 }
0x10b4   : > { %v2756_v32 = vpop.eup %2755 }
0x10b5   : > { %2188 = vst.msk [vmem:[#allocation4] sm:$0x1] %vm2187_vm10, %v2756_v32 }
0x10b6 PF: > { %s3296_s23 = sadd.s32 4294967295, %s2807_s25   ;;  %s2823_s16 = smov [#allocation4]  }
0x10b7   : > { %p3254_p7 = scmp.eq.s32.totalorder %s3296_s23, 1  ;;  %s2198_s19 = sshll.u32 %s2823_s16, 4  ;;  %s2199_s19 = int_to_ptr.vmem [resolvable:$true] %s2198_s19 }
0x10b8   : > { %s2757_s21 = scalar_lea.vmem %s2199_s19, 16  ;;  %s2763_s22 = scalar_lea.vmem %s2199_s19, 32 }
0x10b9   : > { %p2758_p8 = scmp.ne.s32.totalorder %s2199_s19, %s2757_s21  ;;  %p2764_p11 = scmp.lt.s32.totalorder %s2199_s19, %s2199_s19 }
0x10ba   : > { %p2765_p12 = scmp.lt.s32.totalorder %s2763_s22, %s2757_s21 }
0x10bb   : > { %p2759_p9 = pnand %p2758_p8, %p3254_p7 }
0x10bc   : > { %p2766_p13 = por %p2765_p12, %p2764_p11 }
0x10bd   : > { %p2760_p10 = pneg %p2759_p9 }
0x10bf   : > { %p2767_p0 = pnand %p2766_p13, %p2760_p10 }
0x10c1   : > { %2770 = shalt.err (!%p2767_p0)
}
0x10c2   : > { %2623 = dma.vmem_to_hbm [thread:$0]  (%p3254_p7), %s2199_s19, 16, %s3290_s12, [#allocation5]  }
0x10c3   : > { %2794 = dma.done.wait (%p3254_p7), [#allocation5], 16  }
0x10c4   : > { %2796 = vsyncadd (%p3254_p7), [#allocation5], 4294967280 }
0x10c5 PF: > { %s25_s25 = sadd.s32 1, %s2807_s25   ;;  %s3298_s23 = sld [smem:[#allocation7_spill]] }
0x10c6   : > { %p22_p1 = scmp.ge.s32.totalorder %s25_s25, 4   ;;  %s3299_s24 = sld [smem:[#allocation8_spill]] }
0x10c8   :  { %24 = sbr.rel (!%p22_p1) target bundleno = 5 (0x5), region = 124 }
0x10cd   :  { %2211 = vsyncpa [#allocation5], 1 }
0x10ce   :  { %2213 = vsyncpa [#allocation5 + $0x1], 1 }

</bundles_post_ra>
